<compile_context>
chip_gen: v6e
topology: v6e:2x2x1
jax: 0.10.0
libtpu: 0.0.40
codegen_flags: <defaults>
</compile_context>

<pallas_src>
import math
from functools import partial

import jax
import jax.numpy as jnp
from jax.experimental import pallas as pl
from jax.experimental.pallas import tpu as pltpu

LN_EPS = 1e-5
_INV_SQRT2 = 1.0 / math.sqrt(2.0)


# ----------------------------------------------------------------------------
# In-kernel math helpers (also reused by the pure-JAX reference)
# ----------------------------------------------------------------------------
def _erf(x):
    # Abramowitz & Stegun 7.1.26, |err| <= 1.5e-7 -> f32-exact for GELU
    # (matches torch.nn.GELU(approximate='none')).  The exp() lands on the EUP.
    p = 0.3275911
    a1, a2, a3, a4, a5 = (0.254829592, -0.284496736, 1.421413741,
                          -1.453152027, 1.061405429)
    s = jnp.where(x >= 0.0, 1.0, -1.0)
    ax = jnp.abs(x)
    t = 1.0 / (1.0 + p * ax)
    poly = ((((a5 * t + a4) * t + a3) * t + a2) * t + a1) * t
    return s * (1.0 - poly * jnp.exp(-ax * ax))


def _gelu(x):
    return 0.5 * x * (1.0 + _erf(x * _INV_SQRT2))


def _layernorm(x, gamma, beta):
    mu = jnp.mean(x, axis=-1, keepdims=True)
    var = jnp.mean((x - mu) ** 2, axis=-1, keepdims=True)
    return (x - mu) * jax.lax.rsqrt(var + LN_EPS) * gamma + beta


# ----------------------------------------------------------------------------
# Fused GSpadeLayer kernel
#   grid = (n_groups + 1, num_row_tiles)
#     pass 0      : h = GELU(LN_pre(x)) split group-major, hg_0, edge path
#     pass 1..ng  : group gi = pass-1:  agg = A_rows @ hg_gi ;
#                   y = h[gi] + agg@Wl^T + hg_gi@Wr^T + bl ;
#                   hg_{gi+1} = relu(LN_g(y))   (double-buffered hg scratch)
#     last pass   : concat groups, residual + final LayerNorm -> x_out
# ----------------------------------------------------------------------------
def _make_gspade_kernel(n_groups, dg, tile_n, adj_resident):
    assert n_groups >= 2, "GroupAddRev requires n_groups >= 2"
    ng = n_groups
    bf16 = jnp.bfloat16

    def kernel(x_ref, adj_ref, e_ref,
               pre_g_ref, pre_b_ref, grp_g_ref, grp_b_ref,
               wl_t_ref, wr_t_ref, bl_ref, ln_g_ref, ln_b_ref,
               e1_g_ref, e1_b_ref, e_w_t_ref, e_bias_ref, e2_g_ref, e2_b_ref,
               o_ref, e_out_ref,
               h_scr, xc_scr, hg_scr, *rest):
        p = pl.program_id(0)                     # 0 = prep, 1..ng = group pass
        r = pl.program_id(1)                     # row tile
        row0 = pl.multiple_of(r * tile_n, tile_n)
        rows = pl.ds(row0, tile_n)

        if adj_resident:
            # Single-buffered resident adjacency: one HBM->VMEM DMA started at
            # (0,0), waited at (1,0) so it overlaps the whole prep pass.
            adj_vmem, dma_sem = rest
            adj_copy = pltpu.make_async_copy(adj_ref, adj_vmem, dma_sem)

            @pl.when(jnp.logical_and(p == 0, r == 0))
            def _start_adj_copy():
                adj_copy.start()

            @pl.when(jnp.logical_and(p == 1, r == 0))
            def _wait_adj_copy():
                adj_copy.wait()

        # --------------------------- prep pass -----------------------------
        @pl.when(p == 0)
        def _prep():
            x_row = x_ref[...]
            h_row = _gelu(_layernorm(x_row, pre_g_ref[...], pre_b_ref[...]))
            # One-time lane relayout: split into group-major scratch so every
            # later per-group access is a full, unmasked trailing block.
            chunks = [h_row[:, j * dg:(j + 1) * dg] for j in range(ng)]
            for j in range(ng):
                h_scr[j, rows, :] = chunks[j]
            y0 = chunks[1]
            for j in range(2, ng):
                y0 = y0 + chunks[j]
            hg0 = jnp.maximum(
                _layernorm(y0, grp_g_ref[...], grp_b_ref[...]), 0.0)
            hg_scr[0, rows, :] = hg0.astype(bf16)

            # Fused edge path (tiny; computed once, output stays VMEM-resident
            # until the end of the grid).
            @pl.when(r == 0)
            def _edge_path():
                e = e_ref[...]
                eh = _gelu(_layernorm(e, e1_g_ref[...], e1_b_ref[...]))
                eh = (jnp.dot(eh, e_w_t_ref[...],
                              preferred_element_type=jnp.float32)
                      + e_bias_ref[...] + e)
                e_out_ref[...] = _layernorm(eh, e2_g_ref[...], e2_b_ref[...])

        # --------------------------- group passes --------------------------
        @pl.when(p > 0)
        def _group():
            gi = p - 1                           # group index
            rbuf = gi % 2                        # hg_{gi} lives in buffer gi%2
            wbuf = 1 - rbuf

            if adj_resident:
                adj_rows = adj_vmem[rows, :]     # (tile_n, N) bf16
            else:
                adj_rows = adj_ref[...]          # streamed row block

            # mean aggregation over incoming edges == A_rows @ hg (bf16 MXU,
            # f32 accumulation)
            agg = jnp.dot(adj_rows, hg_scr[rbuf],
                          preferred_element_type=jnp.float32)
            hg_rows = hg_scr[rbuf, rows, :]      # (tile_n, dg) bf16
            # SAGEConv output matmuls, both bf16 on the MXU, no VMEM detour.
            conv = (jnp.dot(agg.astype(bf16), wl_t_ref[...],
                            preferred_element_type=jnp.float32)
                    + jnp.dot(hg_rows, wr_t_ref[...],
                              preferred_element_type=jnp.float32)
                    + bl_ref[...])
            y_out = h_scr[gi, rows, :] + conv    # reversible-group residual

            @pl.when(p < ng)                     # not the last group
            def _not_last():
                xc_scr[gi, rows, :] = y_out
                hg_next = jnp.maximum(
                    _layernorm(y_out, grp_g_ref[...], grp_b_ref[...]), 0.0)
                hg_scr[wbuf, rows, :] = hg_next.astype(bf16)

            @pl.when(p == ng)                    # last group: residual + LN
            def _last():
                parts = [xc_scr[j, rows, :] for j in range(ng - 1)]
                parts.append(y_out)
                xc_row = jnp.concatenate(parts, axis=-1)   # one-time relayout
                o_ref[...] = _layernorm(xc_row + x_ref[...],
                                        ln_g_ref[...], ln_b_ref[...])

    return kernel


# ----------------------------------------------------------------------------
# Wrapper-side helpers
# ----------------------------------------------------------------------------
def _vmem_limit_bytes():
    """~84% of physical VMEM (leaves Mosaic internal-scratch headroom)."""
    try:
        cap = int(pltpu.get_tpu_info().vmem_capacity_bytes)
    except Exception:
        return None
    if cap <= 0:
        return None
    return (cap * 27) // 32


def _adjacency_fits_vmem(n, vmem_limit):
    budget = vmem_limit if vmem_limit is not None else (32 << 20)
    # One single-buffered bf16 copy of A may use at most ~1/3 of the budget,
    # leaving room for group scratches and the pipelined row blocks.
    return 2 * n * n <= budget // 3


def _pick_tile_n(n, requested=None):
    if requested is not None:
        assert n % requested == 0
        assert requested == n or requested % 16 == 0
        return requested
    if n % 16 != 0:
        return n                       # single row tile (block == full array)
    for cand in (256, 128, 64, 32, 16):
        if n % cand == 0:
            return cand
    return n


def build_mean_adjacency(edge_index, num_nodes):
    # A[i, j] = (#edges j->i) / deg_in(i); mean aggregation == A @ x.
    # TODO(synk): scatter-add has no clean in-kernel TPU equivalent; built in
    # plain JAX and handed to the kernel (dense formulation is the scaling
    # hazard flagged above).
    src = edge_index[0]
    dst = edge_index[1]
    a = jnp.zeros((num_nodes, num_nodes), jnp.float32).at[dst, src].add(1.0)
    deg = jnp.sum(a, axis=-1, keepdims=True)
    return a / jnp.where(deg > 0.0, deg, 1.0)


# ----------------------------------------------------------------------------
# Public forward
# ----------------------------------------------------------------------------
@partial(jax.jit, static_argnames=("n_groups", "tile_n", "adj_mode"))
def gspade_layer_forward(params, x, edge_index, edge_weights, edge_attr, *,
                         n_groups, tile_n=None, adj_mode="auto"):
    n, d = x.shape
    assert n_groups >= 2 and d % n_groups == 0
    dg = d // n_groups
    e_cnt, de = edge_attr.shape
    f32 = jnp.float32

    tile_n = _pick_tile_n(n, tile_n)
    n_tiles = n // tile_n
    n_pass = n_groups + 1
    last = n_pass - 1

    vmem_limit = _vmem_limit_bytes()
    if adj_mode == "auto":
        adj_resident = _adjacency_fits_vmem(n, vmem_limit)
    else:
        assert adj_mode in ("resident", "stream")
        adj_resident = adj_mode == "resident"

    # Dense row-normalized adjacency in bf16 (MXU input dtype, half the bytes)
    adj = build_mean_adjacency(edge_index, n).astype(jnp.bfloat16)
    # Host-pre-transposed weights: plain (1,0)-contraction in the kernel.
    wl_t = params["lin_l_w"].T.astype(jnp.bfloat16)
    wr_t = params["lin_r_w"].T.astype(jnp.bfloat16)
    e_w_t = params["e_lin_w"].T

    # Index maps (jnp.where keeps blocks resident / avoids useless re-fetches).
    def x_idx(p, r):
        return (jnp.where(jnp.logical_or(p == 0, p == last), r, 0), 0)

    def adj_idx(p, r):
        return (jnp.where(p > 0, r, 0), 0)

    def out_idx(p, r):
        return (jnp.where(p == last, r, 0), 0)

    def fixed(p, r):
        return (0, 0)

    if adj_resident:
        adj_spec = pl.BlockSpec(memory_space=pl.ANY)
    else:
        adj_spec = pl.BlockSpec((tile_n, n), adj_idx)

    in_specs = [
        pl.BlockSpec((tile_n, d), x_idx),                               # x
        adj_spec,                                                       # A
        pl.BlockSpec((e_cnt, de), fixed),                               # edges
        pl.BlockSpec((1, d), fixed), pl.BlockSpec((1, d), fixed),       # pre LN
        pl.BlockSpec((1, dg), fixed), pl.BlockSpec((1, dg), fixed),     # grp LN
        pl.BlockSpec((dg, dg), fixed), pl.BlockSpec((dg, dg), fixed),   # WlT,WrT
        pl.BlockSpec((1, dg), fixed),                                   # bl
        pl.BlockSpec((1, d), fixed), pl.BlockSpec((1, d), fixed),       # out LN
        pl.BlockSpec((1, de), fixed), pl.BlockSpec((1, de), fixed),     # e LN1
        pl.BlockSpec((de, de), fixed), pl.BlockSpec((1, de), fixed),    # e lin
        pl.BlockSpec((1, de), fixed), pl.BlockSpec((1, de), fixed),     # e LN2
    ]
    out_specs = (pl.BlockSpec((tile_n, d), out_idx),
                 pl.BlockSpec((e_cnt, de), fixed))
    out_shape = (jax.ShapeDtypeStruct((n, d), f32),
                 jax.ShapeDtypeStruct((e_cnt, de), f32))

    scratch = [pltpu.VMEM((n_groups, n, dg), f32),          # h, group-major
               pltpu.VMEM((n_groups - 1, n, dg), f32),      # y_out (groups <last)
               pltpu.VMEM((2, n, dg), jnp.bfloat16)]        # hg double buffer
    if adj_resident:
        scratch += [pltpu.VMEM((n, n), jnp.bfloat16),       # resident A (1 buf)
                    pltpu.SemaphoreType.DMA(())]

    cp_kwargs = dict(dimension_semantics=("arbitrary", "arbitrary"))
    if vmem_limit is not None:
        cp_kwargs["vmem_limit_bytes"] = int(vmem_limit)

    kernel = _make_gspade_kernel(n_groups, dg, tile_n, adj_resident)
    x_out, e_out = pl.pallas_call(
        kernel,
        out_shape=out_shape,
        grid=(n_pass, n_tiles),
        in_specs=in_specs,
        out_specs=out_specs,
        scratch_shapes=tuple(scratch),
        compiler_params=pltpu.CompilerParams(**cp_kwargs),
    )(x, adj, edge_attr,
      params["pre_ln_g"], params["pre_ln_b"],
      params["grp_ln_g"], params["grp_ln_b"],
      wl_t, wr_t, params["lin_l_b"],
      params["ln_g"], params["ln_b"],
      params["e_ln1_g"], params["e_ln1_b"],
      e_w_t, params["e_lin_b"],
      params["e_ln2_g"], params["e_ln2_b"])

    # edge_weights passes through unused (PyG SAGEConv mean aggregation ignores
    # edge_weight), matching the reference module.
    return x_out, edge_index, edge_weights, e_out


# ----------------------------------------------------------------------------
# Pure-JAX reference (same math).  match_kernel_dtypes=True reproduces the
# kernel's bf16 casting decisions so the comparison isolates structural bugs.
# ----------------------------------------------------------------------------
def _reference_forward(params, x, edge_index, edge_attr, n_groups,
                       match_kernel_dtypes=False):
    n, d = x.shape
    dg = d // n_groups
    adj = build_mean_adjacency(edge_index, n)
    wl_t, wr_t = params["lin_l_w"].T, params["lin_r_w"].T
    if match_kernel_dtypes:
        adj = adj.astype(jnp.bfloat16)
        wl_t = wl_t.astype(jnp.bfloat16)
        wr_t = wr_t.astype(jnp.bfloat16)

    def cast(v):
        return v.astype(jnp.bfloat16) if match_kernel_dtypes else v

    h = _gelu(_layernorm(x, params["pre_ln_g"], params["pre_ln_b"]))
    xs = [h[:, i * dg:(i + 1) * dg] for i in range(n_groups)]
    y = xs[1]
    for j in range(2, n_groups):
        y = y + xs[j]
    ys = []
    for i in range(n_groups):
        hg = jnp.maximum(
            _layernorm(y, params["grp_ln_g"], params["grp_ln_b"]), 0.0)
        hg_c = cast(hg)
        agg = jnp.dot(cast(adj) if match_kernel_dtypes else adj, hg_c,
                      preferred_element_type=jnp.float32)
        conv = (jnp.dot(cast(agg), wl_t, preferred_element_type=jnp.float32)
                + jnp.dot(hg_c, wr_t, preferred_element_type=jnp.float32)
                + params["lin_l_b"])
        y = xs[i] + conv
        ys.append(y)
    x_conv = jnp.concatenate(ys, axis=-1)
    x_out = _layernorm(x_conv + x, params["ln_g"], params["ln_b"])

    e = edge_attr
    eh = _gelu(_layernorm(e, params["e_ln1_g"], params["e_ln1_b"]))
    eh = (jnp.dot(eh, params["e_lin_w"].T, preferred_element_type=jnp.float32)
          + params["e_lin_b"] + e)
    e_out = _layernorm(eh, params["e_ln2_g"], params["e_ln2_b"])
    return x_out, e_out


# ----------------------------------------------------------------------------
# Deterministic parameter init (shapes follow the module's __init__; GroupAddRev
# deepcopies the RevGNNLayer at init -> one shared parameter set per group)
# ----------------------------------------------------------------------------
def init_params(key, d_hidden, d_edge, n_groups):
    dg = d_hidden // n_groups
    ks = jax.random.split(key, 16)
    f32 = jnp.float32

    def ln(kg, kb, dim):
        g = 1.0 + 0.1 * jax.random.normal(kg, (1, dim), f32)
        b = 0.1 * jax.random.normal(kb, (1, dim), f32)
        return g, b

    def lin_w(k, d_out, d_in):
        s = 1.0 / math.sqrt(d_in)
        return jax.random.uniform(k, (d_out, d_in), f32, -s, s)

    pre_g, pre_b = ln(ks[0], ks[1], d_hidden)     # pre_layer_norm
    grp_g, grp_b = ln(ks[2], ks[3], dg)           # RevGNNLayer.norm (shared)
    ln_g, ln_b = ln(ks[4], ks[5], d_hidden)       # layer_norm
    e1_g, e1_b = ln(ks[6], ks[7], d_edge)         # edge_tf[0] LayerNorm
    e2_g, e2_b = ln(ks[8], ks[9], d_edge)         # edge_norm

    return {
        "pre_ln_g": pre_g, "pre_ln_b": pre_b,
        "grp_ln_g": grp_g, "grp_ln_b": grp_b,
        "lin_l_w": lin_w(ks[10], dg, dg),                       # SAGEConv.lin_l
        "lin_l_b": 0.1 * jax.random.normal(ks[11], (1, dg), f32),
        "lin_r_w": lin_w(ks[12], dg, dg),                       # SAGEConv.lin_r
        "ln_g": ln_g, "ln_b": ln_b,
        "e_ln1_g": e1_g, "e_ln1_b": e1_b,
        "e_lin_w": lin_w(ks[13], d_edge, d_edge),               # edge_tf[2]
        "e_lin_b": 0.1 * jax.random.normal(ks[14], (1, d_edge), f32),
        "e_ln2_g": e2_g, "e_ln2_b": e2_b,
    }


if __name__ == "__main__":
    key = jax.random.PRNGKey(0)
    N, D_HIDDEN, D_EDGE, E = 32, 32, 16, 48

    k_x, k_ei, k_ew, k_ea, k_p1, k_p2 = jax.random.split(key, 6)
    x = jax.random.normal(k_x, (N, D_HIDDEN), jnp.float32)
    edge_index = jax.random.randint(k_ei, (2, E), 0, N, jnp.int32)
    edge_weights = jax.random.uniform(k_ew, (E,), jnp.float32)
    edge_attr = jax.random.normal(k_ea, (E, D_EDGE), jnp.float32)

    configs = (
        (2, k_p1, ("resident", "stream")),   # exercise both adjacency paths
        (4, k_p2, ("auto",)),                # multi-group (hg buffer parity)
    )
    for n_groups, k_p, adj_modes in configs:
        params = init_params(k_p, D_HIDDEN, D_EDGE, n_groups)
        x_f32, e_f32 = _reference_forward(params, x, edge_index, edge_attr,
                                          n_groups)
        x_bf, _ = _reference_forward(params, x, edge_index, edge_attr,
                                     n_groups, match_kernel_dtypes=True)
        for mode in adj_modes:
            x_out, ei_out, ew_out, e_out = gspade_layer_forward(
                params, x, edge_index, edge_weights, edge_attr,
                n_groups=n_groups, tile_n=16, adj_mode=mode)
            jax.block_until_ready((x_out, ei_out, ew_out, e_out))

            assert x_out.shape == (N, D_HIDDEN)
            assert e_out.shape == (E, D_EDGE)
            # Tight check vs a bf16-cast-matched reference (isolates structure)
            assert float(jnp.max(jnp.abs(x_out - x_bf))) < 5e-2
            # Loose check vs the pure-f32 reference (bounds bf16 drift)
            assert float(jnp.max(jnp.abs(x_out - x_f32))) < 3e-1
            # Edge path is fully f32 inside the kernel
            assert float(jnp.max(jnp.abs(e_out - e_f32))) < 2e-3

    print("KERNEL_OK")
</pallas_src>

<mosaic_0001>
module attributes {stable_mosaic.version = 11 : i64} {
  func.func private @main(%arg0: i32) attributes {dimension_semantics = [#tpu.dimension_semantics<core_parallel>], iteration_bounds = array<i64: 2>, tpu.core_type = #tpu.core_type<sc_scalar_subcore>, window_params = []} {
    return
  }
}

module attributes {stable_mosaic.version = 11 : i64} {
  func.func private @main(%arg0: i32) attributes {dimension_semantics = [#tpu.dimension_semantics<core_parallel>], iteration_bounds = array<i64: 2>, tpu.core_type = #tpu.core_type<sc_scalar_subcore>, window_params = []} {
    return
  }
}

module attributes {stable_mosaic.version = 11 : i64} {
  func.func @kernel(%arg0: i32, %arg1: i32, %arg2: memref<16x32xf32, #tpu.memory_space<vmem>>, %arg3: memref<32x32xbf16, #tpu.memory_space<any>>, %arg4: memref<48x16xf32, #tpu.memory_space<vmem>>, %arg5: memref<1x32xf32, #tpu.memory_space<vmem>>, %arg6: memref<1x32xf32, #tpu.memory_space<vmem>>, %arg7: memref<1x16xf32, #tpu.memory_space<vmem>>, %arg8: memref<1x16xf32, #tpu.memory_space<vmem>>, %arg9: memref<16x16xbf16, #tpu.memory_space<vmem>>, %arg10: memref<16x16xbf16, #tpu.memory_space<vmem>>, %arg11: memref<1x16xf32, #tpu.memory_space<vmem>>, %arg12: memref<1x32xf32, #tpu.memory_space<vmem>>, %arg13: memref<1x32xf32, #tpu.memory_space<vmem>>, %arg14: memref<1x16xf32, #tpu.memory_space<vmem>>, %arg15: memref<1x16xf32, #tpu.memory_space<vmem>>, %arg16: memref<16x16xf32, #tpu.memory_space<vmem>>, %arg17: memref<1x16xf32, #tpu.memory_space<vmem>>, %arg18: memref<1x16xf32, #tpu.memory_space<vmem>>, %arg19: memref<1x16xf32, #tpu.memory_space<vmem>>, %arg20: memref<16x32xf32, #tpu.memory_space<vmem>>, %arg21: memref<48x16xf32, #tpu.memory_space<vmem>>, %arg22: memref<2x32x16xf32, #tpu.memory_space<vmem>>, %arg23: memref<1x32x16xf32, #tpu.memory_space<vmem>>, %arg24: memref<2x32x16xbf16, #tpu.memory_space<vmem>>, %arg25: memref<32x32xbf16, #tpu.memory_space<vmem>>, %arg26: memref<!tpu.dma_semaphore, #tpu.memory_space<semaphore_mem>>) attributes {dimension_semantics = [#tpu.dimension_semantics<arbitrary>, #tpu.dimension_semantics<arbitrary>], iteration_bounds = array<i64: 3, 2>, scalar_prefetch = 0 : i64, scratch_operands = 5 : i64, tpu.core_type = #tpu.core_type<tc>, window_params = [{transform_indices = @transform_0, window_bounds = array<i64: 16, 32>}, {}, {pipeline_mode = #tpu.pipeline_mode<synchronous>, transform_indices = @transform_2, window_bounds = array<i64: 48, 16>}, {pipeline_mode = #tpu.pipeline_mode<synchronous>, transform_indices = @transform_3, window_bounds = array<i64: 1, 32>}, {pipeline_mode = #tpu.pipeline_mode<synchronous>, transform_indices = @transform_4, window_bounds = array<i64: 1, 32>}, {pipeline_mode = #tpu.pipeline_mode<synchronous>, transform_indices = @transform_5, window_bounds = array<i64: 1, 16>}, {pipeline_mode = #tpu.pipeline_mode<synchronous>, transform_indices = @transform_6, window_bounds = array<i64: 1, 16>}, {pipeline_mode = #tpu.pipeline_mode<synchronous>, transform_indices = @transform_7, window_bounds = array<i64: 16, 16>}, {pipeline_mode = #tpu.pipeline_mode<synchronous>, transform_indices = @transform_8, window_bounds = array<i64: 16, 16>}, {pipeline_mode = #tpu.pipeline_mode<synchronous>, transform_indices = @transform_9, window_bounds = array<i64: 1, 16>}, {pipeline_mode = #tpu.pipeline_mode<synchronous>, transform_indices = @transform_10, window_bounds = array<i64: 1, 32>}, {pipeline_mode = #tpu.pipeline_mode<synchronous>, transform_indices = @transform_11, window_bounds = array<i64: 1, 32>}, {pipeline_mode = #tpu.pipeline_mode<synchronous>, transform_indices = @transform_12, window_bounds = array<i64: 1, 16>}, {pipeline_mode = #tpu.pipeline_mode<synchronous>, transform_indices = @transform_13, window_bounds = array<i64: 1, 16>}, {pipeline_mode = #tpu.pipeline_mode<synchronous>, transform_indices = @transform_14, window_bounds = array<i64: 16, 16>}, {pipeline_mode = #tpu.pipeline_mode<synchronous>, transform_indices = @transform_15, window_bounds = array<i64: 1, 16>}, {pipeline_mode = #tpu.pipeline_mode<synchronous>, transform_indices = @transform_16, window_bounds = array<i64: 1, 16>}, {pipeline_mode = #tpu.pipeline_mode<synchronous>, transform_indices = @transform_17, window_bounds = array<i64: 1, 16>}, {transform_indices = @transform_18, window_bounds = array<i64: 16, 32>}, {pipeline_mode = #tpu.pipeline_mode<synchronous>, transform_indices = @transform_19, window_bounds = array<i64: 48, 16>}]} {
    %c16_i32 = arith.constant 16 : i32
    %0 = arith.muli %arg1, %c16_i32 : i32
    %1 = tpu.assume_multiple %0, 16 : i32
    %c0_i32 = arith.constant 0 : i32
    %2 = arith.cmpi eq, %arg0, %c0_i32 : i32
    %c0_i32_0 = arith.constant 0 : i32
    %3 = arith.cmpi eq, %arg1, %c0_i32_0 : i32
    %4 = arith.andi %2, %3 : i1
    %5 = arith.extui %4 : i1 to i32
    %c0_i32_1 = arith.constant 0 : i32
    %6 = arith.cmpi ne, %5, %c0_i32_1 : i32
    scf.if %6 {
      tpu.enqueue_dma source(%arg3 : memref<32x32xbf16, #tpu.memory_space<any>>) target(%arg25 : memref<32x32xbf16, #tpu.memory_space<vmem>>) target_semaphore(%arg26 : memref<!tpu.dma_semaphore, #tpu.memory_space<semaphore_mem>>)
    } else {
    }
    %c1_i32 = arith.constant 1 : i32
    %7 = arith.cmpi eq, %arg0, %c1_i32 : i32
    %c0_i32_2 = arith.constant 0 : i32
    %8 = arith.cmpi eq, %arg1, %c0_i32_2 : i32
    %9 = arith.andi %7, %8 : i1
    %10 = arith.extui %9 : i1 to i32
    %c0_i32_3 = arith.constant 0 : i32
    %11 = arith.cmpi ne, %10, %c0_i32_3 : i32
    scf.if %11 {
      tpu.wait_dma2 semaphore(%arg26 : memref<!tpu.dma_semaphore, #tpu.memory_space<semaphore_mem>>) src(%arg3 : memref<32x32xbf16, #tpu.memory_space<any>>) dst(%arg25 : memref<32x32xbf16, #tpu.memory_space<vmem>>)
    } else {
    }
    %c0_i32_4 = arith.constant 0 : i32
    %12 = arith.cmpi eq, %arg0, %c0_i32_4 : i32
    %13 = arith.extui %12 : i1 to i32
    %c0_i32_5 = arith.constant 0 : i32
    %14 = arith.cmpi ne, %13, %c0_i32_5 : i32
    scf.if %14 {
      %c0 = arith.constant 0 : index
      %c0_8 = arith.constant 0 : index
      %18 = vector.load %arg2[%c0, %c0_8] : memref<16x32xf32, #tpu.memory_space<vmem>>, vector<16x32xf32>
      %c0_9 = arith.constant 0 : index
      %c0_10 = arith.constant 0 : index
      %19 = vector.load %arg5[%c0_9, %c0_10] : memref<1x32xf32, #tpu.memory_space<vmem>>, vector<1x32xf32>
      %c0_11 = arith.constant 0 : index
      %c0_12 = arith.constant 0 : index
      %20 = vector.load %arg6[%c0_11, %c0_12] : memref<1x32xf32, #tpu.memory_space<vmem>>, vector<1x32xf32>
      %cst = arith.constant dense<0.000000e+00> : vector<16xf32>
      %21 = vector.multi_reduction <add>, %18, %cst [1] : vector<16x32xf32> to vector<16xf32>
      %22 = vector.shape_cast %21 : vector<16xf32> to vector<16x1xf32>
      %cst_13 = arith.constant 3.200000e+01 : f32
      %23 = vector.broadcast %cst_13 : f32 to vector<16x1xf32>
      %24 = arith.divf %22, %23 : vector<16x1xf32>
      %25 = vector.broadcast %24 : vector<16x1xf32> to vector<16x32xf32>
      %26 = arith.subf %18, %25 : vector<16x32xf32>
      %27 = arith.mulf %26, %26 : vector<16x32xf32>
      %cst_14 = arith.constant dense<0.000000e+00> : vector<16xf32>
      %28 = vector.multi_reduction <add>, %27, %cst_14 [1] : vector<16x32xf32> to vector<16xf32>
      %29 = vector.shape_cast %28 : vector<16xf32> to vector<16x1xf32>
      %cst_15 = arith.constant 3.200000e+01 : f32
      %30 = vector.broadcast %cst_15 : f32 to vector<16x1xf32>
      %31 = arith.divf %29, %30 : vector<16x1xf32>
      %32 = vector.broadcast %24 : vector<16x1xf32> to vector<16x32xf32>
      %33 = arith.subf %18, %32 : vector<16x32xf32>
      %cst_16 = arith.constant 9.99999974E-6 : f32
      %34 = vector.broadcast %cst_16 : f32 to vector<16x1xf32>
      %35 = arith.addf %31, %34 : vector<16x1xf32>
      %36 = math.rsqrt %35 : vector<16x1xf32>
      %37 = vector.broadcast %36 : vector<16x1xf32> to vector<16x32xf32>
      %38 = arith.mulf %33, %37 : vector<16x32xf32>
      %39 = vector.broadcast %19 : vector<1x32xf32> to vector<16x32xf32>
      %40 = arith.mulf %38, %39 : vector<16x32xf32>
      %41 = vector.broadcast %20 : vector<1x32xf32> to vector<16x32xf32>
      %42 = arith.addf %40, %41 : vector<16x32xf32>
      %cst_17 = arith.constant 5.000000e-01 : f32
      %43 = vector.broadcast %cst_17 : f32 to vector<16x32xf32>
      %44 = arith.mulf %43, %42 : vector<16x32xf32>
      %cst_18 = arith.constant 0.707106769 : f32
      %45 = vector.broadcast %cst_18 : f32 to vector<16x32xf32>
      %46 = arith.mulf %42, %45 : vector<16x32xf32>
      %cst_19 = arith.constant 0.000000e+00 : f32
      %47 = vector.broadcast %cst_19 : f32 to vector<16x32xf32>
      %48 = arith.cmpf oge, %46, %47 : vector<16x32xf32>
      %cst_20 = arith.constant 1.000000e+00 : f32
      %cst_21 = arith.constant -1.000000e+00 : f32
      %49 = vector.broadcast %cst_20 : f32 to vector<16x32xf32>
      %50 = vector.broadcast %cst_21 : f32 to vector<16x32xf32>
      %51 = arith.select %48, %49, %50 : vector<16x32xi1>, vector<16x32xf32>
      %52 = math.absf %46 : vector<16x32xf32>
      %cst_22 = arith.constant 0.327591091 : f32
      %53 = vector.broadcast %cst_22 : f32 to vector<16x32xf32>
      %54 = arith.mulf %53, %52 : vector<16x32xf32>
      %cst_23 = arith.constant 1.000000e+00 : f32
      %55 = vector.broadcast %cst_23 : f32 to vector<16x32xf32>
      %56 = arith.addf %55, %54 : vector<16x32xf32>
      %cst_24 = arith.constant 1.000000e+00 : f32
      %57 = vector.broadcast %cst_24 : f32 to vector<16x32xf32>
      %58 = arith.divf %57, %56 : vector<16x32xf32>
      %cst_25 = arith.constant 1.06140542 : f32
      %59 = vector.broadcast %cst_25 : f32 to vector<16x32xf32>
      %60 = arith.mulf %59, %58 : vector<16x32xf32>
      %cst_26 = arith.constant -1.45315206 : f32
      %61 = vector.broadcast %cst_26 : f32 to vector<16x32xf32>
      %62 = arith.addf %60, %61 : vector<16x32xf32>
      %63 = arith.mulf %62, %58 : vector<16x32xf32>
      %cst_27 = arith.constant 1.42141378 : f32
      %64 = vector.broadcast %cst_27 : f32 to vector<16x32xf32>
      %65 = arith.addf %63, %64 : vector<16x32xf32>
      %66 = arith.mulf %65, %58 : vector<16x32xf32>
      %cst_28 = arith.constant -0.284496725 : f32
      %67 = vector.broadcast %cst_28 : f32 to vector<16x32xf32>
      %68 = arith.addf %66, %67 : vector<16x32xf32>
      %69 = arith.mulf %68, %58 : vector<16x32xf32>
      %cst_29 = arith.constant 0.254829586 : f32
      %70 = vector.broadcast %cst_29 : f32 to vector<16x32xf32>
      %71 = arith.addf %69, %70 : vector<16x32xf32>
      %72 = arith.mulf %71, %58 : vector<16x32xf32>
      %cst_30 = arith.constant 0.000000e+00 : f32
      %73 = vector.broadcast %cst_30 : f32 to vector<16x32xf32>
      %74 = arith.subf %73, %52 : vector<16x32xf32>
      %75 = arith.mulf %74, %52 : vector<16x32xf32>
      %76 = math.exp %75 : vector<16x32xf32>
      %77 = arith.mulf %72, %76 : vector<16x32xf32>
      %cst_31 = arith.constant 1.000000e+00 : f32
      %78 = vector.broadcast %cst_31 : f32 to vector<16x32xf32>
      %79 = arith.subf %78, %77 : vector<16x32xf32>
      %80 = arith.mulf %51, %79 : vector<16x32xf32>
      %cst_32 = arith.constant 1.000000e+00 : f32
      %81 = vector.broadcast %cst_32 : f32 to vector<16x32xf32>
      %82 = arith.addf %81, %80 : vector<16x32xf32>
      %83 = arith.mulf %44, %82 : vector<16x32xf32>
      %84 = vector.extract_strided_slice %83 {offsets = [0, 0], sizes = [16, 16], strides = [1, 1]} : vector<16x32xf32> to vector<16x16xf32>
      %85 = vector.extract_strided_slice %83 {offsets = [0, 16], sizes = [16, 16], strides = [1, 1]} : vector<16x32xf32> to vector<16x16xf32>
      %c0_33 = arith.constant 0 : index
      %86 = arith.index_cast %1 : i32 to index
      %c0_34 = arith.constant 0 : index
      %87 = vector.load %arg22[%c0_33, %86, %c0_34] : memref<2x32x16xf32, #tpu.memory_space<vmem>>, vector<1x16x16xf32>
      %88 = vector.shape_cast %87 : vector<1x16x16xf32> to vector<16x16xf32>
      %89 = vector.shape_cast %84 : vector<16x16xf32> to vector<1x16x16xf32>
      tpu.vector_store %arg22[%c0_33, %86, %c0_34], %89 {strides = array<i32>} : memref<2x32x16xf32, #tpu.memory_space<vmem>>, vector<1x16x16xf32>,
      %c1 = arith.constant 1 : index
      %90 = arith.index_cast %1 : i32 to index
      %c0_35 = arith.constant 0 : index
      %91 = vector.load %arg22[%c1, %90, %c0_35] : memref<2x32x16xf32, #tpu.memory_space<vmem>>, vector<1x16x16xf32>
      %92 = vector.shape_cast %91 : vector<1x16x16xf32> to vector<16x16xf32>
      %93 = vector.shape_cast %85 : vector<16x16xf32> to vector<1x16x16xf32>
      tpu.vector_store %arg22[%c1, %90, %c0_35], %93 {strides = array<i32>} : memref<2x32x16xf32, #tpu.memory_space<vmem>>, vector<1x16x16xf32>,
      %c0_36 = arith.constant 0 : index
      %c0_37 = arith.constant 0 : index
      %94 = vector.load %arg7[%c0_36, %c0_37] : memref<1x16xf32, #tpu.memory_space<vmem>>, vector<1x16xf32>
      %c0_38 = arith.constant 0 : index
      %c0_39 = arith.constant 0 : index
      %95 = vector.load %arg8[%c0_38, %c0_39] : memref<1x16xf32, #tpu.memory_space<vmem>>, vector<1x16xf32>
      %cst_40 = arith.constant dense<0.000000e+00> : vector<16xf32>
      %96 = vector.multi_reduction <add>, %85, %cst_40 [1] : vector<16x16xf32> to vector<16xf32>
      %97 = vector.shape_cast %96 : vector<16xf32> to vector<16x1xf32>
      %cst_41 = arith.constant 1.600000e+01 : f32
      %98 = vector.broadcast %cst_41 : f32 to vector<16x1xf32>
      %99 = arith.divf %97, %98 : vector<16x1xf32>
      %100 = vector.broadcast %99 : vector<16x1xf32> to vector<16x16xf32>
      %101 = arith.subf %85, %100 : vector<16x16xf32>
      %102 = arith.mulf %101, %101 : vector<16x16xf32>
      %cst_42 = arith.constant dense<0.000000e+00> : vector<16xf32>
      %103 = vector.multi_reduction <add>, %102, %cst_42 [1] : vector<16x16xf32> to vector<16xf32>
      %104 = vector.shape_cast %103 : vector<16xf32> to vector<16x1xf32>
      %cst_43 = arith.constant 1.600000e+01 : f32
      %105 = vector.broadcast %cst_43 : f32 to vector<16x1xf32>
      %106 = arith.divf %104, %105 : vector<16x1xf32>
      %107 = vector.broadcast %99 : vector<16x1xf32> to vector<16x16xf32>
      %108 = arith.subf %85, %107 : vector<16x16xf32>
      %cst_44 = arith.constant 9.99999974E-6 : f32
      %109 = vector.broadcast %cst_44 : f32 to vector<16x1xf32>
      %110 = arith.addf %106, %109 : vector<16x1xf32>
      %111 = math.rsqrt %110 : vector<16x1xf32>
      %112 = vector.broadcast %111 : vector<16x1xf32> to vector<16x16xf32>
      %113 = arith.mulf %108, %112 : vector<16x16xf32>
      %114 = vector.broadcast %94 : vector<1x16xf32> to vector<16x16xf32>
      %115 = arith.mulf %113, %114 : vector<16x16xf32>
      %116 = vector.broadcast %95 : vector<1x16xf32> to vector<16x16xf32>
      %117 = arith.addf %115, %116 : vector<16x16xf32>
      %cst_45 = arith.constant 0.000000e+00 : f32
      %118 = vector.broadcast %cst_45 : f32 to vector<16x16xf32>
      %119 = arith.maximumf %117, %118 : vector<16x16xf32>
      %120 = arith.truncf %119 : vector<16x16xf32> to vector<16x16xbf16>
      %c0_46 = arith.constant 0 : index
      %121 = arith.index_cast %1 : i32 to index
      %c0_47 = arith.constant 0 : index
      %122 = vector.load %arg24[%c0_46, %121, %c0_47] : memref<2x32x16xbf16, #tpu.memory_space<vmem>>, vector<1x16x16xbf16>
      %123 = vector.shape_cast %122 : vector<1x16x16xbf16> to vector<16x16xbf16>
      %124 = vector.shape_cast %120 : vector<16x16xbf16> to vector<1x16x16xbf16>
      tpu.vector_store %arg24[%c0_46, %121, %c0_47], %124 {strides = array<i32>} : memref<2x32x16xbf16, #tpu.memory_space<vmem>>, vector<1x16x16xbf16>,
      %c0_i32_48 = arith.constant 0 : i32
      %125 = arith.cmpi eq, %arg1, %c0_i32_48 : i32
      %126 = arith.extui %125 : i1 to i32
      %c0_i32_49 = arith.constant 0 : i32
      %127 = arith.cmpi ne, %126, %c0_i32_49 : i32
      scf.if %127 {
        %c0_50 = arith.constant 0 : index
        %c0_51 = arith.constant 0 : index
        %128 = vector.load %arg4[%c0_50, %c0_51] : memref<48x16xf32, #tpu.memory_space<vmem>>, vector<48x16xf32>
        %c0_52 = arith.constant 0 : index
        %c0_53 = arith.constant 0 : index
        %129 = vector.load %arg14[%c0_52, %c0_53] : memref<1x16xf32, #tpu.memory_space<vmem>>, vector<1x16xf32>
        %c0_54 = arith.constant 0 : index
        %c0_55 = arith.constant 0 : index
        %130 = vector.load %arg15[%c0_54, %c0_55] : memref<1x16xf32, #tpu.memory_space<vmem>>, vector<1x16xf32>
        %cst_56 = arith.constant dense<0.000000e+00> : vector<48xf32>
        %131 = vector.multi_reduction <add>, %128, %cst_56 [1] : vector<48x16xf32> to vector<48xf32>
        %132 = vector.shape_cast %131 : vector<48xf32> to vector<48x1xf32>
        %cst_57 = arith.constant 1.600000e+01 : f32
        %133 = vector.broadcast %cst_57 : f32 to vector<48x1xf32>
        %134 = arith.divf %132, %133 : vector<48x1xf32>
        %135 = vector.broadcast %134 : vector<48x1xf32> to vector<48x16xf32>
        %136 = arith.subf %128, %135 : vector<48x16xf32>
        %137 = arith.mulf %136, %136 : vector<48x16xf32>
        %cst_58 = arith.constant dense<0.000000e+00> : vector<48xf32>
        %138 = vector.multi_reduction <add>, %137, %cst_58 [1] : vector<48x16xf32> to vector<48xf32>
        %139 = vector.shape_cast %138 : vector<48xf32> to vector<48x1xf32>
        %cst_59 = arith.constant 1.600000e+01 : f32
        %140 = vector.broadcast %cst_59 : f32 to vector<48x1xf32>
        %141 = arith.divf %139, %140 : vector<48x1xf32>
        %142 = vector.broadcast %134 : vector<48x1xf32> to vector<48x16xf32>
        %143 = arith.subf %128, %142 : vector<48x16xf32>
        %cst_60 = arith.constant 9.99999974E-6 : f32
        %144 = vector.broadcast %cst_60 : f32 to vector<48x1xf32>
        %145 = arith.addf %141, %144 : vector<48x1xf32>
        %146 = math.rsqrt %145 : vector<48x1xf32>
        %147 = vector.broadcast %146 : vector<48x1xf32> to vector<48x16xf32>
        %148 = arith.mulf %143, %147 : vector<48x16xf32>
        %149 = vector.broadcast %129 : vector<1x16xf32> to vector<48x16xf32>
        %150 = arith.mulf %148, %149 : vector<48x16xf32>
        %151 = vector.broadcast %130 : vector<1x16xf32> to vector<48x16xf32>
        %152 = arith.addf %150, %151 : vector<48x16xf32>
        %cst_61 = arith.constant 5.000000e-01 : f32
        %153 = vector.broadcast %cst_61 : f32 to vector<48x16xf32>
        %154 = arith.mulf %153, %152 : vector<48x16xf32>
        %cst_62 = arith.constant 0.707106769 : f32
        %155 = vector.broadcast %cst_62 : f32 to vector<48x16xf32>
        %156 = arith.mulf %152, %155 : vector<48x16xf32>
        %cst_63 = arith.constant 0.000000e+00 : f32
        %157 = vector.broadcast %cst_63 : f32 to vector<48x16xf32>
        %158 = arith.cmpf oge, %156, %157 : vector<48x16xf32>
        %cst_64 = arith.constant 1.000000e+00 : f32
        %cst_65 = arith.constant -1.000000e+00 : f32
        %159 = vector.broadcast %cst_64 : f32 to vector<48x16xf32>
        %160 = vector.broadcast %cst_65 : f32 to vector<48x16xf32>
        %161 = arith.select %158, %159, %160 : vector<48x16xi1>, vector<48x16xf32>
        %162 = math.absf %156 : vector<48x16xf32>
        %cst_66 = arith.constant 0.327591091 : f32
        %163 = vector.broadcast %cst_66 : f32 to vector<48x16xf32>
        %164 = arith.mulf %163, %162 : vector<48x16xf32>
        %cst_67 = arith.constant 1.000000e+00 : f32
        %165 = vector.broadcast %cst_67 : f32 to vector<48x16xf32>
        %166 = arith.addf %165, %164 : vector<48x16xf32>
        %cst_68 = arith.constant 1.000000e+00 : f32
        %167 = vector.broadcast %cst_68 : f32 to vector<48x16xf32>
        %168 = arith.divf %167, %166 : vector<48x16xf32>
        %cst_69 = arith.constant 1.06140542 : f32
        %169 = vector.broadcast %cst_69 : f32 to vector<48x16xf32>
        %170 = arith.mulf %169, %168 : vector<48x16xf32>
        %cst_70 = arith.constant -1.45315206 : f32
        %171 = vector.broadcast %cst_70 : f32 to vector<48x16xf32>
        %172 = arith.addf %170, %171 : vector<48x16xf32>
        %173 = arith.mulf %172, %168 : vector<48x16xf32>
        %cst_71 = arith.constant 1.42141378 : f32
        %174 = vector.broadcast %cst_71 : f32 to vector<48x16xf32>
        %175 = arith.addf %173, %174 : vector<48x16xf32>
        %176 = arith.mulf %175, %168 : vector<48x16xf32>
        %cst_72 = arith.constant -0.284496725 : f32
        %177 = vector.broadcast %cst_72 : f32 to vector<48x16xf32>
        %178 = arith.addf %176, %177 : vector<48x16xf32>
        %179 = arith.mulf %178, %168 : vector<48x16xf32>
        %cst_73 = arith.constant 0.254829586 : f32
        %180 = vector.broadcast %cst_73 : f32 to vector<48x16xf32>
        %181 = arith.addf %179, %180 : vector<48x16xf32>
        %182 = arith.mulf %181, %168 : vector<48x16xf32>
        %cst_74 = arith.constant 0.000000e+00 : f32
        %183 = vector.broadcast %cst_74 : f32 to vector<48x16xf32>
        %184 = arith.subf %183, %162 : vector<48x16xf32>
        %185 = arith.mulf %184, %162 : vector<48x16xf32>
        %186 = math.exp %185 : vector<48x16xf32>
        %187 = arith.mulf %182, %186 : vector<48x16xf32>
        %cst_75 = arith.constant 1.000000e+00 : f32
        %188 = vector.broadcast %cst_75 : f32 to vector<48x16xf32>
        %189 = arith.subf %188, %187 : vector<48x16xf32>
        %190 = arith.mulf %161, %189 : vector<48x16xf32>
        %cst_76 = arith.constant 1.000000e+00 : f32
        %191 = vector.broadcast %cst_76 : f32 to vector<48x16xf32>
        %192 = arith.addf %191, %190 : vector<48x16xf32>
        %193 = arith.mulf %154, %192 : vector<48x16xf32>
        %c0_77 = arith.constant 0 : index
        %c0_78 = arith.constant 0 : index
        %194 = vector.load %arg16[%c0_77, %c0_78] : memref<16x16xf32, #tpu.memory_space<vmem>>, vector<16x16xf32>
        %cst_79 = arith.constant dense<0.000000e+00> : vector<48x16xf32>
        %195 = tpu.matmul %193, %194, %cst_79 {dimension_numbers = #tpu.dot_dimension_numbers<[1], [0], [0], [1], [0, 0, 1, 1], [], []>} : vector<48x16xf32>, vector<16x16xf32>, vector<48x16xf32> -> vector<48x16xf32>
        %c0_80 = arith.constant 0 : index
        %c0_81 = arith.constant 0 : index
        %196 = vector.load %arg17[%c0_80, %c0_81] : memref<1x16xf32, #tpu.memory_space<vmem>>, vector<1x16xf32>
        %197 = vector.broadcast %196 : vector<1x16xf32> to vector<48x16xf32>
        %198 = arith.addf %195, %197 : vector<48x16xf32>
        %199 = arith.addf %198, %128 : vector<48x16xf32>
        %c0_82 = arith.constant 0 : index
        %c0_83 = arith.constant 0 : index
        %200 = vector.load %arg18[%c0_82, %c0_83] : memref<1x16xf32, #tpu.memory_space<vmem>>, vector<1x16xf32>
        %c0_84 = arith.constant 0 : index
        %c0_85 = arith.constant 0 : index
        %201 = vector.load %arg19[%c0_84, %c0_85] : memref<1x16xf32, #tpu.memory_space<vmem>>, vector<1x16xf32>
        %cst_86 = arith.constant dense<0.000000e+00> : vector<48xf32>
        %202 = vector.multi_reduction <add>, %199, %cst_86 [1] : vector<48x16xf32> to vector<48xf32>
        %203 = vector.shape_cast %202 : vector<48xf32> to vector<48x1xf32>
        %cst_87 = arith.constant 1.600000e+01 : f32
        %204 = vector.broadcast %cst_87 : f32 to vector<48x1xf32>
        %205 = arith.divf %203, %204 : vector<48x1xf32>
        %206 = vector.broadcast %205 : vector<48x1xf32> to vector<48x16xf32>
        %207 = arith.subf %199, %206 : vector<48x16xf32>
        %208 = arith.mulf %207, %207 : vector<48x16xf32>
        %cst_88 = arith.constant dense<0.000000e+00> : vector<48xf32>
        %209 = vector.multi_reduction <add>, %208, %cst_88 [1] : vector<48x16xf32> to vector<48xf32>
        %210 = vector.shape_cast %209 : vector<48xf32> to vector<48x1xf32>
        %cst_89 = arith.constant 1.600000e+01 : f32
        %211 = vector.broadcast %cst_89 : f32 to vector<48x1xf32>
        %212 = arith.divf %210, %211 : vector<48x1xf32>
        %213 = vector.broadcast %205 : vector<48x1xf32> to vector<48x16xf32>
        %214 = arith.subf %199, %213 : vector<48x16xf32>
        %cst_90 = arith.constant 9.99999974E-6 : f32
        %215 = vector.broadcast %cst_90 : f32 to vector<48x1xf32>
        %216 = arith.addf %212, %215 : vector<48x1xf32>
        %217 = math.rsqrt %216 : vector<48x1xf32>
        %218 = vector.broadcast %217 : vector<48x1xf32> to vector<48x16xf32>
        %219 = arith.mulf %214, %218 : vector<48x16xf32>
        %220 = vector.broadcast %200 : vector<1x16xf32> to vector<48x16xf32>
        %221 = arith.mulf %219, %220 : vector<48x16xf32>
        %222 = vector.broadcast %201 : vector<1x16xf32> to vector<48x16xf32>
        %223 = arith.addf %221, %222 : vector<48x16xf32>
        %c0_91 = arith.constant 0 : index
        %c0_92 = arith.constant 0 : index
        %224 = vector.load %arg21[%c0_91, %c0_92] : memref<48x16xf32, #tpu.memory_space<vmem>>, vector<48x16xf32>
        tpu.vector_store %arg21[%c0_91, %c0_92], %223 {strides = array<i32>} : memref<48x16xf32, #tpu.memory_space<vmem>>, vector<48x16xf32>,
      } else {
      }
    } else {
    }
    %c0_i32_6 = arith.constant 0 : i32
    %15 = arith.cmpi sgt, %arg0, %c0_i32_6 : i32
    %16 = arith.extui %15 : i1 to i32
    %c0_i32_7 = arith.constant 0 : i32
    %17 = arith.cmpi ne, %16, %c0_i32_7 : i32
    scf.if %17 {
      %c1_i32_8 = arith.constant 1 : i32
      %18 = arith.subi %arg0, %c1_i32_8 : i32
      %c2_i32 = arith.constant 2 : i32
      %c0_i32_9 = arith.constant 0 : i32
      %19 = arith.cmpi eq, %c2_i32, %c0_i32_9 : i32
      %c1_i32_10 = arith.constant 1 : i32
      %20 = arith.select %19, %c1_i32_10, %c2_i32 : i32
      %21 = arith.remsi %18, %20 : i32
      %c0_i32_11 = arith.constant 0 : i32
      %22 = arith.cmpi ne, %21, %c0_i32_11 : i32
      %c0_i32_12 = arith.constant 0 : i32
      %23 = arith.cmpi slt, %21, %c0_i32_12 : i32
      %c0_i32_13 = arith.constant 0 : i32
      %24 = arith.cmpi slt, %20, %c0_i32_13 : i32
      %25 = arith.xori %23, %24 : i1
      %26 = arith.andi %25, %22 : i1
      %27 = arith.addi %21, %20 : i32
      %28 = arith.select %26, %27, %21 : i32
      %c1_i32_14 = arith.constant 1 : i32
      %29 = arith.subi %c1_i32_14, %28 : i32
      %30 = arith.index_cast %1 : i32 to index
      %c0 = arith.constant 0 : index
      %31 = vector.load %arg25[%30, %c0] : memref<32x32xbf16, #tpu.memory_space<vmem>>, vector<16x32xbf16>
      %32 = arith.index_cast %28 : i32 to index
      %c0_15 = arith.constant 0 : index
      %c0_16 = arith.constant 0 : index
      %33 = vector.load %arg24[%32, %c0_15, %c0_16] : memref<2x32x16xbf16, #tpu.memory_space<vmem>>, vector<1x32x16xbf16>
      %34 = vector.shape_cast %33 : vector<1x32x16xbf16> to vector<32x16xbf16>
      %cst = arith.constant dense<0.000000e+00> : vector<16x16xf32>
      %35 = tpu.matmul %31, %34, %cst {dimension_numbers = #tpu.dot_dimension_numbers<[1], [0], [0], [1], [0, 0, 1, 1], [], []>} : vector<16x32xbf16>, vector<32x16xbf16>, vector<16x16xf32> -> vector<16x16xf32>
      %36 = arith.index_cast %28 : i32 to index
      %37 = arith.index_cast %1 : i32 to index
      %c0_17 = arith.constant 0 : index
      %38 = vector.load %arg24[%36, %37, %c0_17] : memref<2x32x16xbf16, #tpu.memory_space<vmem>>, vector<1x16x16xbf16>
      %39 = vector.shape_cast %38 : vector<1x16x16xbf16> to vector<16x16xbf16>
      %40 = arith.truncf %35 : vector<16x16xf32> to vector<16x16xbf16>
      %c0_18 = arith.constant 0 : index
      %c0_19 = arith.constant 0 : index
      %41 = vector.load %arg9[%c0_18, %c0_19] : memref<16x16xbf16, #tpu.memory_space<vmem>>, vector<16x16xbf16>
      %cst_20 = arith.constant dense<0.000000e+00> : vector<16x16xf32>
      %42 = tpu.matmul %40, %41, %cst_20 {dimension_numbers = #tpu.dot_dimension_numbers<[1], [0], [0], [1], [0, 0, 1, 1], [], []>} : vector<16x16xbf16>, vector<16x16xbf16>, vector<16x16xf32> -> vector<16x16xf32>
      %c0_21 = arith.constant 0 : index
      %c0_22 = arith.constant 0 : index
      %43 = vector.load %arg10[%c0_21, %c0_22] : memref<16x16xbf16, #tpu.memory_space<vmem>>, vector<16x16xbf16>
      %cst_23 = arith.constant dense<0.000000e+00> : vector<16x16xf32>
      %44 = tpu.matmul %39, %43, %cst_23 {dimension_numbers = #tpu.dot_dimension_numbers<[1], [0], [0], [1], [0, 0, 1, 1], [], []>} : vector<16x16xbf16>, vector<16x16xbf16>, vector<16x16xf32> -> vector<16x16xf32>
      %45 = arith.addf %42, %44 : vector<16x16xf32>
      %c0_24 = arith.constant 0 : index
      %c0_25 = arith.constant 0 : index
      %46 = vector.load %arg11[%c0_24, %c0_25] : memref<1x16xf32, #tpu.memory_space<vmem>>, vector<1x16xf32>
      %47 = vector.broadcast %46 : vector<1x16xf32> to vector<16x16xf32>
      %48 = arith.addf %45, %47 : vector<16x16xf32>
      %49 = arith.index_cast %18 : i32 to index
      %50 = arith.index_cast %1 : i32 to index
      %c0_26 = arith.constant 0 : index
      %51 = vector.load %arg22[%49, %50, %c0_26] : memref<2x32x16xf32, #tpu.memory_space<vmem>>, vector<1x16x16xf32>
      %52 = vector.shape_cast %51 : vector<1x16x16xf32> to vector<16x16xf32>
      %53 = arith.addf %52, %48 : vector<16x16xf32>
      %c2_i32_27 = arith.constant 2 : i32
      %54 = arith.cmpi slt, %arg0, %c2_i32_27 : i32
      %55 = arith.extui %54 : i1 to i32
      %c0_i32_28 = arith.constant 0 : i32
      %56 = arith.cmpi ne, %55, %c0_i32_28 : i32
      scf.if %56 {
        %60 = arith.index_cast %18 : i32 to index
        %61 = arith.index_cast %1 : i32 to index
        %c0_31 = arith.constant 0 : index
        %62 = vector.load %arg23[%60, %61, %c0_31] : memref<1x32x16xf32, #tpu.memory_space<vmem>>, vector<1x16x16xf32>
        %63 = vector.shape_cast %62 : vector<1x16x16xf32> to vector<16x16xf32>
        %64 = vector.shape_cast %53 : vector<16x16xf32> to vector<1x16x16xf32>
        tpu.vector_store %arg23[%60, %61, %c0_31], %64 {strides = array<i32>} : memref<1x32x16xf32, #tpu.memory_space<vmem>>, vector<1x16x16xf32>,
        %c0_32 = arith.constant 0 : index
        %c0_33 = arith.constant 0 : index
        %65 = vector.load %arg7[%c0_32, %c0_33] : memref<1x16xf32, #tpu.memory_space<vmem>>, vector<1x16xf32>
        %c0_34 = arith.constant 0 : index
        %c0_35 = arith.constant 0 : index
        %66 = vector.load %arg8[%c0_34, %c0_35] : memref<1x16xf32, #tpu.memory_space<vmem>>, vector<1x16xf32>
        %cst_36 = arith.constant dense<0.000000e+00> : vector<16xf32>
        %67 = vector.multi_reduction <add>, %53, %cst_36 [1] : vector<16x16xf32> to vector<16xf32>
        %68 = vector.shape_cast %67 : vector<16xf32> to vector<16x1xf32>
        %cst_37 = arith.constant 1.600000e+01 : f32
        %69 = vector.broadcast %cst_37 : f32 to vector<16x1xf32>
        %70 = arith.divf %68, %69 : vector<16x1xf32>
        %71 = vector.broadcast %70 : vector<16x1xf32> to vector<16x16xf32>
        %72 = arith.subf %53, %71 : vector<16x16xf32>
        %73 = arith.mulf %72, %72 : vector<16x16xf32>
        %cst_38 = arith.constant dense<0.000000e+00> : vector<16xf32>
        %74 = vector.multi_reduction <add>, %73, %cst_38 [1] : vector<16x16xf32> to vector<16xf32>
        %75 = vector.shape_cast %74 : vector<16xf32> to vector<16x1xf32>
        %cst_39 = arith.constant 1.600000e+01 : f32
        %76 = vector.broadcast %cst_39 : f32 to vector<16x1xf32>
        %77 = arith.divf %75, %76 : vector<16x1xf32>
        %78 = vector.broadcast %70 : vector<16x1xf32> to vector<16x16xf32>
        %79 = arith.subf %53, %78 : vector<16x16xf32>
        %cst_40 = arith.constant 9.99999974E-6 : f32
        %80 = vector.broadcast %cst_40 : f32 to vector<16x1xf32>
        %81 = arith.addf %77, %80 : vector<16x1xf32>
        %82 = math.rsqrt %81 : vector<16x1xf32>
        %83 = vector.broadcast %82 : vector<16x1xf32> to vector<16x16xf32>
        %84 = arith.mulf %79, %83 : vector<16x16xf32>
        %85 = vector.broadcast %65 : vector<1x16xf32> to vector<16x16xf32>
        %86 = arith.mulf %84, %85 : vector<16x16xf32>
        %87 = vector.broadcast %66 : vector<1x16xf32> to vector<16x16xf32>
        %88 = arith.addf %86, %87 : vector<16x16xf32>
        %cst_41 = arith.constant 0.000000e+00 : f32
        %89 = vector.broadcast %cst_41 : f32 to vector<16x16xf32>
        %90 = arith.maximumf %88, %89 : vector<16x16xf32>
        %91 = arith.truncf %90 : vector<16x16xf32> to vector<16x16xbf16>
        %92 = arith.index_cast %29 : i32 to index
        %93 = arith.index_cast %1 : i32 to index
        %c0_42 = arith.constant 0 : index
        %94 = vector.load %arg24[%92, %93, %c0_42] : memref<2x32x16xbf16, #tpu.memory_space<vmem>>, vector<1x16x16xbf16>
        %95 = vector.shape_cast %94 : vector<1x16x16xbf16> to vector<16x16xbf16>
        %96 = vector.shape_cast %91 : vector<16x16xbf16> to vector<1x16x16xbf16>
        tpu.vector_store %arg24[%92, %93, %c0_42], %96 {strides = array<i32>} : memref<2x32x16xbf16, #tpu.memory_space<vmem>>, vector<1x16x16xbf16>,
      } else {
      }
      %c2_i32_29 = arith.constant 2 : i32
      %57 = arith.cmpi eq, %arg0, %c2_i32_29 : i32
      %58 = arith.extui %57 : i1 to i32
      %c0_i32_30 = arith.constant 0 : i32
      %59 = arith.cmpi ne, %58, %c0_i32_30 : i32
      scf.if %59 {
        %c0_31 = arith.constant 0 : index
        %60 = arith.index_cast %1 : i32 to index
        %c0_32 = arith.constant 0 : index
        %61 = vector.load %arg23[%c0_31, %60, %c0_32] : memref<1x32x16xf32, #tpu.memory_space<vmem>>, vector<1x16x16xf32>
        %62 = vector.shape_cast %61 : vector<1x16x16xf32> to vector<16x16xf32>
        %63 = tpu.concatenate %62, %53 in 1 : vector<16x16xf32>, vector<16x16xf32> -> vector<16x32xf32>
        %c0_33 = arith.constant 0 : index
        %c0_34 = arith.constant 0 : index
        %64 = vector.load %arg2[%c0_33, %c0_34] : memref<16x32xf32, #tpu.memory_space<vmem>>, vector<16x32xf32>
        %65 = arith.addf %63, %64 : vector<16x32xf32>
        %c0_35 = arith.constant 0 : index
        %c0_36 = arith.constant 0 : index
        %66 = vector.load %arg12[%c0_35, %c0_36] : memref<1x32xf32, #tpu.memory_space<vmem>>, vector<1x32xf32>
        %c0_37 = arith.constant 0 : index
        %c0_38 = arith.constant 0 : index
        %67 = vector.load %arg13[%c0_37, %c0_38] : memref<1x32xf32, #tpu.memory_space<vmem>>, vector<1x32xf32>
        %cst_39 = arith.constant dense<0.000000e+00> : vector<16xf32>
        %68 = vector.multi_reduction <add>, %65, %cst_39 [1] : vector<16x32xf32> to vector<16xf32>
        %69 = vector.shape_cast %68 : vector<16xf32> to vector<16x1xf32>
        %cst_40 = arith.constant 3.200000e+01 : f32
        %70 = vector.broadcast %cst_40 : f32 to vector<16x1xf32>
        %71 = arith.divf %69, %70 : vector<16x1xf32>
        %72 = vector.broadcast %71 : vector<16x1xf32> to vector<16x32xf32>
        %73 = arith.subf %65, %72 : vector<16x32xf32>
        %74 = arith.mulf %73, %73 : vector<16x32xf32>
        %cst_41 = arith.constant dense<0.000000e+00> : vector<16xf32>
        %75 = vector.multi_reduction <add>, %74, %cst_41 [1] : vector<16x32xf32> to vector<16xf32>
        %76 = vector.shape_cast %75 : vector<16xf32> to vector<16x1xf32>
        %cst_42 = arith.constant 3.200000e+01 : f32
        %77 = vector.broadcast %cst_42 : f32 to vector<16x1xf32>
        %78 = arith.divf %76, %77 : vector<16x1xf32>
        %79 = vector.broadcast %71 : vector<16x1xf32> to vector<16x32xf32>
        %80 = arith.subf %65, %79 : vector<16x32xf32>
        %cst_43 = arith.constant 9.99999974E-6 : f32
        %81 = vector.broadcast %cst_43 : f32 to vector<16x1xf32>
        %82 = arith.addf %78, %81 : vector<16x1xf32>
        %83 = math.rsqrt %82 : vector<16x1xf32>
        %84 = vector.broadcast %83 : vector<16x1xf32> to vector<16x32xf32>
        %85 = arith.mulf %80, %84 : vector<16x32xf32>
        %86 = vector.broadcast %66 : vector<1x32xf32> to vector<16x32xf32>
        %87 = arith.mulf %85, %86 : vector<16x32xf32>
        %88 = vector.broadcast %67 : vector<1x32xf32> to vector<16x32xf32>
        %89 = arith.addf %87, %88 : vector<16x32xf32>
        %c0_44 = arith.constant 0 : index
        %c0_45 = arith.constant 0 : index
        %90 = vector.load %arg20[%c0_44, %c0_45] : memref<16x32xf32, #tpu.memory_space<vmem>>, vector<16x32xf32>
        tpu.vector_store %arg20[%c0_44, %c0_45], %89 {strides = array<i32>} : memref<16x32xf32, #tpu.memory_space<vmem>>, vector<16x32xf32>,
      } else {
      }
    } else {
    }
    return
  }
  func.func @transform_0(%arg0: i32, %arg1: i32) -> (i32, i32) {
    %c0_i32 = arith.constant 0 : i32
    %0 = arith.cmpi eq, %arg0, %c0_i32 : i32
    %c2_i32 = arith.constant 2 : i32
    %1 = arith.cmpi eq, %arg0, %c2_i32 : i32
    %2 = arith.ori %0, %1 : i1
    %c0_i32_0 = arith.constant 0 : i32
    %3 = arith.select %2, %arg1, %c0_i32_0 : i32
    %c0_i32_1 = arith.constant 0 : i32
    %c0_i32_2 = arith.constant 0 : i32
    return %3, %c0_i32_1 : i32, i32
  }
  func.func @transform_2(%arg0: i32, %arg1: i32) -> (i32, i32) {
    %c0_i32 = arith.constant 0 : i32
    %c0_i32_0 = arith.constant 0 : i32
    %c0_i32_1 = arith.constant 0 : i32
    return %c0_i32, %c0_i32_0 : i32, i32
  }
  func.func @transform_3(%arg0: i32, %arg1: i32) -> (i32, i32) {
    %c0_i32 = arith.constant 0 : i32
    %c0_i32_0 = arith.constant 0 : i32
    %c0_i32_1 = arith.constant 0 : i32
    return %c0_i32, %c0_i32_0 : i32, i32
  }
  func.func @transform_4(%arg0: i32, %arg1: i32) -> (i32, i32) {
    %c0_i32 = arith.constant 0 : i32
    %c0_i32_0 = arith.constant 0 : i32
    %c0_i32_1 = arith.constant 0 : i32
    return %c0_i32, %c0_i32_0 : i32, i32
  }
  func.func @transform_5(%arg0: i32, %arg1: i32) -> (i32, i32) {
    %c0_i32 = arith.constant 0 : i32
    %c0_i32_0 = arith.constant 0 : i32
    %c0_i32_1 = arith.constant 0 : i32
    return %c0_i32, %c0_i32_0 : i32, i32
  }
  func.func @transform_6(%arg0: i32, %arg1: i32) -> (i32, i32) {
    %c0_i32 = arith.constant 0 : i32
    %c0_i32_0 = arith.constant 0 : i32
    %c0_i32_1 = arith.constant 0 : i32
    return %c0_i32, %c0_i32_0 : i32, i32
  }
  func.func @transform_7(%arg0: i32, %arg1: i32) -> (i32, i32) {
    %c0_i32 = arith.constant 0 : i32
    %c0_i32_0 = arith.constant 0 : i32
    %c0_i32_1 = arith.constant 0 : i32
    return %c0_i32, %c0_i32_0 : i32, i32
  }
  func.func @transform_8(%arg0: i32, %arg1: i32) -> (i32, i32) {
    %c0_i32 = arith.constant 0 : i32
    %c0_i32_0 = arith.constant 0 : i32
    %c0_i32_1 = arith.constant 0 : i32
    return %c0_i32, %c0_i32_0 : i32, i32
  }
  func.func @transform_9(%arg0: i32, %arg1: i32) -> (i32, i32) {
    %c0_i32 = arith.constant 0 : i32
    %c0_i32_0 = arith.constant 0 : i32
    %c0_i32_1 = arith.constant 0 : i32
    return %c0_i32, %c0_i32_0 : i32, i32
  }
  func.func @transform_10(%arg0: i32, %arg1: i32) -> (i32, i32) {
    %c0_i32 = arith.constant 0 : i32
    %c0_i32_0 = arith.constant 0 : i32
    %c0_i32_1 = arith.constant 0 : i32
    return %c0_i32, %c0_i32_0 : i32, i32
  }
  func.func @transform_11(%arg0: i32, %arg1: i32) -> (i32, i32) {
    %c0_i32 = arith.constant 0 : i32
    %c0_i32_0 = arith.constant 0 : i32
    %c0_i32_1 = arith.constant 0 : i32
    return %c0_i32, %c0_i32_0 : i32, i32
  }
  func.func @transform_12(%arg0: i32, %arg1: i32) -> (i32, i32) {
    %c0_i32 = arith.constant 0 : i32
    %c0_i32_0 = arith.constant 0 : i32
    %c0_i32_1 = arith.constant 0 : i32
    return %c0_i32, %c0_i32_0 : i32, i32
  }
  func.func @transform_13(%arg0: i32, %arg1: i32) -> (i32, i32) {
    %c0_i32 = arith.constant 0 : i32
    %c0_i32_0 = arith.constant 0 : i32
    %c0_i32_1 = arith.constant 0 : i32
    return %c0_i32, %c0_i32_0 : i32, i32
  }
  func.func @transform_14(%arg0: i32, %arg1: i32) -> (i32, i32) {
    %c0_i32 = arith.constant 0 : i32
    %c0_i32_0 = arith.constant 0 : i32
    %c0_i32_1 = arith.constant 0 : i32
    return %c0_i32, %c0_i32_0 : i32, i32
  }
  func.func @transform_15(%arg0: i32, %arg1: i32) -> (i32, i32) {
    %c0_i32 = arith.constant 0 : i32
    %c0_i32_0 = arith.constant 0 : i32
    %c0_i32_1 = arith.constant 0 : i32
    return %c0_i32, %c0_i32_0 : i32, i32
  }
  func.func @transform_16(%arg0: i32, %arg1: i32) -> (i32, i32) {
    %c0_i32 = arith.constant 0 : i32
    %c0_i32_0 = arith.constant 0 : i32
    %c0_i32_1 = arith.constant 0 : i32
    return %c0_i32, %c0_i32_0 : i32, i32
  }
  func.func @transform_17(%arg0: i32, %arg1: i32) -> (i32, i32) {
    %c0_i32 = arith.constant 0 : i32
    %c0_i32_0 = arith.constant 0 : i32
    %c0_i32_1 = arith.constant 0 : i32
    return %c0_i32, %c0_i32_0 : i32, i32
  }
  func.func @transform_18(%arg0: i32, %arg1: i32) -> (i32, i32) {
    %c2_i32 = arith.constant 2 : i32
    %0 = arith.cmpi eq, %arg0, %c2_i32 : i32
    %c0_i32 = arith.constant 0 : i32
    %1 = arith.select %0, %arg1, %c0_i32 : i32
    %c0_i32_0 = arith.constant 0 : i32
    %c0_i32_1 = arith.constant 0 : i32
    return %1, %c0_i32_0 : i32, i32
  }
  func.func @transform_19(%arg0: i32, %arg1: i32) -> (i32, i32) {
    %c0_i32 = arith.constant 0 : i32
    %c0_i32_0 = arith.constant 0 : i32
    %c0_i32_1 = arith.constant 0 : i32
    return %c0_i32, %c0_i32_0 : i32, i32
  }
}

</mosaic_0001>

<bundles_post_ra>
// kernel: gspade_layer_forward.1
= control target key start
LH: loop header
LB: loop body
LE: loop exit
PB: predicated region body
PF: predicated region fallthrough
CT: control target
= control target key end

     0   :  { %s2906_s0 = inlined_call_operand.vmem [shape: f32[32,32], index: 0, kind: input, shape index: {}]   ;;  %s2907_s1 = inlined_call_operand.vmem [shape: bf16[32,32], index: 1, kind: input, shape index: {}]   ;;  %s2908_s2 = inlined_call_operand.vmem [shape: f32[48,16], index: 2, kind: input, shape index: {}]   ;;  %s2909_s3 = inlined_call_operand.vmem [shape: f32[1,32], index: 3, kind: input, shape index: {}]   ;;  %s2910_s4 = inlined_call_operand.vmem [shape: f32[1,32], index: 4, kind: input, shape index: {}]   ;;  %s2911_s5 = inlined_call_operand.vmem [shape: f32[1,16], index: 5, kind: input, shape index: {}]   ;;  %s2912_s6 = inlined_call_operand.vmem [shape: f32[1,16], index: 6, kind: input, shape index: {}]   ;;  %s2913_s7 = inlined_call_operand.vmem [shape: bf16[16,16], index: 7, kind: input, shape index: {}]   ;;  %s2914_s8 = inlined_call_operand.vmem [shape: bf16[16,16], index: 8, kind: input, shape index: {}]   ;;  %s2915_s9 = inlined_call_operand.vmem [shape: f32[1,16], index: 9, kind: input, shape index: {}]   ;;  %s2916_s10 = inlined_call_operand.vmem [shape: f32[1,32], index: 10, kind: input, shape index: {}]   ;;  %s2917_s11 = inlined_call_operand.vmem [shape: f32[1,32], index: 11, kind: input, shape index: {}]   ;;  %s2918_s12 = inlined_call_operand.vmem [shape: f32[1,16], index: 12, kind: input, shape index: {}]   ;;  %s2919_s13 = inlined_call_operand.vmem [shape: f32[1,16], index: 13, kind: input, shape index: {}]   ;;  %s2920_s14 = inlined_call_operand.vmem [shape: f32[16,16], index: 14, kind: input, shape index: {}]   ;;  %s2921_s15 = inlined_call_operand.vmem [shape: f32[1,16], index: 15, kind: input, shape index: {}]   ;;  %s2922_s16 = inlined_call_operand.vmem [shape: f32[1,16], index: 16, kind: input, shape index: {}]   ;;  %s2923_s17 = inlined_call_operand.vmem [shape: f32[1,16], index: 17, kind: input, shape index: {}]   ;;  %s2924_s18 = inlined_call_operand.hbm [shape: f32[32,32], index: 18, kind: output, shape index: {0}]   ;;  %s2925_s19 = inlined_call_operand.vmem [shape: f32[48,16], index: 19, kind: output, shape index: {1}]  }
   0x1   :  { %2942 = sst [smem:[#allocation23_spill]] %s2906_s0 }
   0x2   :  { %2943 = sst [smem:[#allocation24_spill]] %s2907_s1 }
   0x3   :  { %2944 = sst [smem:[#allocation25_spill]] %s2908_s2 }
   0x4   :  { %2945 = sst [smem:[#allocation26_spill]] %s2909_s3 }
   0x5   :  { %2946 = sst [smem:[#allocation27_spill]] %s2910_s4 }
   0x6   :  { %2947 = sst [smem:[#allocation28_spill]] %s2914_s8 }
   0x7   :  { %2948 = sst [smem:[#allocation29_spill]] %s2917_s11 }
   0x8   :  { %2949 = sst [smem:[#allocation30_spill]] %s2918_s12 }
   0x9   :  { %2950 = sst [smem:[#allocation31_spill]] %s2919_s13 }
   0xa   :  { %2951 = sst [smem:[#allocation32_spill]] %s2924_s18 }
   0xb   :  { %25 = vsyncpa [#allocation8], 0 }
   0xc   :  { %27 = vsyncpa [#allocation8 + $0x1], 0  ;;  %s2390_s0 = smov 0   ;;  %s2392_s30 = smov 0  }
   0xd   :  { %s2394_s20 = smov 0   ;;  %s2396_s21 = smov 0  }
   0xe   :  { %s2398_s1 = smov 0   ;;  %s2400_s22 = smov 0  }
   0xf   :  { %s2402_s2 = smov 0   ;;  %s2404_s23 = smov 0  }
  0x10 LB: > { %2952 = sst [smem:[#allocation12_spill]] %s2250_s0  ;;  %s1896_s24 = sadd.s32 4294967295, %s2278_s23   ;;  %s2278_s23 = sphi %s2404_s23, %s33_s23   ;;  %s2274_s2 = sphi %s2402_s2, %s2987_s2   ;;  %s2270_s22 = sphi %s2400_s22, %s2986_s22   ;;  %s2266_s1 = sphi %s2398_s1, %s2985_s1   ;;  %s2262_s21 = sphi %s2396_s21, %s2984_s21   ;;  %s2258_s20 = sphi %s2394_s20, %s2983_s20   ;;  %s2254_s30 = sphi %s2392_s30, %s2982_s30   ;;  %s2250_s0 = sphi %s2390_s0, %s2981_s0  }
  0x11   : > { %2953 = sst [smem:[#allocation13_spill]] %s2254_s30  ;;  %s42_s25 = sadd.s32 1, %s2270_s22 }
  0x12   : > { %2954 = sst [smem:[#allocation14_spill]] %s2258_s20  ;;  %s45_s3 = sadd.s32 1, %s2274_s2 }
  0x13   : > { %2955 = sst [smem:[#allocation15_spill]] %s2270_s22  ;;  %p43_p0 = scmp.ge.s32.totalorder %s42_s25, 2 }
  0x14   : > { %2956 = sst [smem:[#allocation16_spill]] %s2274_s2  ;;  %p419_p1 = scmp.eq.s32.totalorder %s2274_s2, 2 }
  0x15   : > { %2957 = sst [smem:[#allocation17_spill]] %s2278_s23  ;;  %s1897_s26 = sadd.s32 4294967294, %s2278_s23  }
  0x16   : > { %p436_p2 = scmp.ne.s32.totalorder %s2258_s20, %s2254_s30  ;;  %s2989_s25 = smov (%p43_p0, %s42_s25), 0 }
  0x17   : > { %2958 = sst [smem:[#allocation18_spill]] %s2989_s25  ;;  %s2991_s3 = smov (!%p43_p0, %s45_s3), %s2274_s2 }
  0x18   : > { %s420_s27 = scalar_select %p419_p1, %s2270_s22, 0 }
  0x19   : > { %p47_p3 = scmp.ge.s32.totalorder %s2991_s3, 3  ;;  %p437_p4 = scmp.eq.s32.totalorder %s1896_s24, 5 }
  0x1a   : > { %p442_p5 = scmp.ne.s32.totalorder %s2254_s30, %s2250_s0  ;;  %p443_p6 = scmp.eq.s32.totalorder %s1897_s26, 5 }
  0x1b   : > { %s2993_s3 = smov (%p47_p3, %s2991_s3), 0  ;;  %p2445_p7 = por %p437_p4, %p436_p2 }
  0x1c   : > { %2959 = sst [smem:[#allocation19_spill]] %s2993_s3  ;;  %p2449_p8 = por %p443_p6, %p442_p5 }
  0x1d   : > { %s2960_s28 = scalar_select %p2445_p7, 1, 0 }
  0x1e   : > { %s2962_s29 = scalar_select %p2449_p8, 1, 0 }
  0x1f   : > { %2961 = sst [smem:[#allocation20_spill]] %s2960_s28  ;;  %p421_p9 = scmp.eq.s32.totalorder %s2993_s3, 2 }
  0x20   : > { %2963 = sst [smem:[#allocation21_spill]] %s2962_s29  ;;  %p1900_p10 = scmp.ge.s32.totalorder %s2278_s23, 1 }
  0x21   : > { %p547_p11 = scmp.lt.s32.totalorder %s2278_s23, 7  ;;  %s426_s24 = sadd.s32 1, %s2258_s20 }
  0x22   : > { %s422_s2 = scalar_select %p421_p9, %s2989_s25, 0 }
  0x23   : > { %p548_p12 = pnand %p1900_p10, %p547_p11 }
  0x24   : > { %s423_s22 = ssub.s32 %s420_s27, %s422_s2  ;;  %s2937_s3 = sand.u32 (!%p548_p12), 1, %s2254_s30  }
  0x25   : > { %p424_p13 = scmp.eq.s32.totalorder %s423_s22, 0  ;;  %551 = sbr.rel (%p548_p12) target bundleno = 3177 (0xc69), region = 88 }
  0x26   : > { %p605_p0 = scmp.eq.s32.totalorder (!%p548_p12), %s2266_s1, 0  ;;  %s1901_s25 = sshll.u32 (!%p548_p12), %s2937_s3, 4 }
  0x27   : > { %s2459_s26 = scalar_select %p424_p13, %s2258_s20, %s426_s24  }
  0x28   : > { %p606_p1 = scmp.eq.s32.totalorder (!%p548_p12), %s2266_s1, 2  ;;  %s2467_s2 = sshll.u32 (!%p548_p12), %s2262_s21, 4 }
  0x29   : > { %2964 = sst [smem:[#allocation22_spill]] %s2459_s26  ;;  %p625_p3 = scmp.eq.s32.totalorder (!%p548_p12), %s2262_s21, 0 }
  0x2a   : > { %p607_p2 = por %p606_p1, %p605_p0  ;;  %s2965_s29 = sld [smem:[#allocation23_spill]] }
  0x2b   : > { %p626_p4 = pnand %p625_p3, %p605_p0  ;;  %s2480_s23 = scalar_lea.vmem [#allocation7], %s1901_s25 }
  0x2c   : > { %s608_s22 = scalar_select %p607_p2, %s2262_s21, 0 }
  0x2d   : > { %s2966_s28 = sld [smem:[#allocation24_spill]] (!%p626_p4) }
  0x2e   : > { %s1902_s27 = sshll.u32 %s608_s22, 1 }
  0x2f   : > { %p610_p5 = scmp.lt.s32.totalorder %s1902_s27, 3  ;;  %629 = sbr.rel (%p626_p4) target bundleno = 55 (0x37), region = 92 }
  0x31   : > { %s2995_s27 = smov (!%p610_p5, %s1902_s27), 3 }
  0x32   : > { %s1903_s24 = sshll.u32 %s2995_s27, 3 }
  0x33   : > { %s2478_s0 = scalar_lea.vmem %s2965_s29, %s1903_s24 }
  0x34   : > { %v663_v0 = vld [vmem:[%s2966_s28] sm:$0xff]  ;;  %v665_v1 = vld [vmem:[%s2966_s28 + $0x8] sm:$0xff] }
  0x35   : > { %664 = vst [vmem:[#allocation5] sm:$0xff] %v663_v0  ;;  %666 = vst [vmem:[#allocation5 + $0x8] sm:$0xff] %v665_v1 }
  0x36   : > { %674 = vsyncadd [#allocation6], 256 }
  0x37 PF: > { %p675_p6 = scmp.eq.s32.totalorder %s2266_s1, 1 }
  0x39   : > { %p676_p9 = pnand %p675_p6, %p625_p3 }
  0x3b   : > { %p2022_p10 = pneg %p676_p9 }
  0x3d   : > { %2241 = dma.done.wait (%p2022_p10), [#allocation6], 256 }
  0x3e   : > { %2243 = vsyncadd (%p2022_p10), [#allocation6], 4294967040  ;;  %p1905_p11 = scmp.ne.s32.totalorder %s2266_s1, 0 }
  0x3f   : > { %s2967_s30 = sld [smem:[#allocation26_spill]] (!%p1905_p11)  ;;  %s2281_s3 = smov (!%p1905_p11), 112  }
  0x40   : > { %686 = sbr.rel (%p1905_p11) target bundleno = 1973 (0x7b5), region = 134  ;;  %s2968_s4 = sld [smem:[#allocation27_spill]] (!%p1905_p11) }
  0x41   : > { %s789_s29 = scalar_lea.vmem (!%p1905_p11), [#allocation2], %s2467_s2  ;;  %s2282_s27 = smov (!%p1905_p11), 16  }
  0x42   : > { %s876_s18 = sshra.s32 (!%p1905_p11), %s2467_s2, 3  ;;  %p1916_p12 = scmp.ne.s32.totalorder (!%p1905_p11), %s2262_s21, 0 }
  0x45   : > { %v687_v2 = vld [vmem:[%s2478_s0] sm:$0xff]  ;;  %vm691_vm0 = vcmask 261120   ;;  %v688_v3 = vld [vmem:[%s2478_s0 + $0x8] sm:$0xff]  ;;  %vm790_vm3 = vcmask 130048   ;;  %vm880_vm4 = vcmask 125952   ;;  %s2969_s26 = sld [smem:[#allocation25_spill]] (!%p1916_p12) }
  0x46   : > { %v692_v4 = vsel %vm691_vm0, %v687_v2, 0.0  ;;  %v695_v5 = vsel %vm691_vm0, %v688_v3, 0.0  ;;  %v1906_v23 = vld [vmem:[%s2967_s30] ss:$0 sm:$0xff]  ;;  %s1915_s30 = sshll.u32 %s876_s18, 2  ;;  %s2970_s12 = sld [smem:[#allocation30_spill]] (!%p1916_p12) }
  0x47   : > { %693 = vadd.xlane.f32.xlu0 %v692_v4  ;;  %v1907_v25 = vld [vmem:[%s2968_s4] ss:$0 sm:$0xff]  ;;  %s879_s20 = scalar_lea.vmem [#allocation4], %s1915_s30  ;;  %s2971_s13 = sld [smem:[#allocation31_spill]] (!%p1916_p12) }
  0x4b   : > { %696 = vadd.xlane.f32.xlu0 %v695_v5 }
  0xd0   : > { %v694_v6 = vpop.xlane.xlu0 %693 }
  0xd1   : > { %v699_v7 = vmul.f32 0.03125, %v694_v6  ;;  %v2280_v6 = vmov -1.0  }
  0xd3   : > { %v701_v8 = vsub.f32 %v687_v2, %v699_v7 }
  0xd4   : > { %v697_v9 = vpop.xlane.xlu0 %696 }
  0xd5   : > { %v700_v10 = vmul.f32 0.03125, %v697_v9  ;;  %v703_v11 = vmul.f32 %v701_v8, %v701_v8 }
  0xd7   : > { %v702_v12 = vsub.f32 %v688_v3, %v700_v10  ;;  %v705_v13 = vsel %vm691_vm0, %v703_v11, 0.0 }
  0xd8   : > { %706 = vadd.xlane.f32.xlu1 %v705_v13 }
  0xd9   : > { %v704_v14 = vmul.f32 %v702_v12, %v702_v12 }
  0xdb   : > { %v708_v15 = vsel %vm691_vm0, %v704_v14, 0.0 }
  0xdc   : > { %709 = vadd.xlane.f32.xlu1 %v708_v15 }
 0x161   : > { %v707_v16 = vpop.xlane.xlu1 %706 }
 0x162   : > { %v711_v17 = vmul.f32 0.03125, %v707_v16 }
 0x164   : > { %v713_v18 = vadd.f32 1e-05, %v711_v17 }
 0x165   : > { %v710_v19 = vpop.xlane.xlu1 %709 }
 0x166   : > { %2104 = vrsqrt.f32 %v713_v18  ;;  %v712_v20 = vmul.f32 0.03125, %v710_v19 }
 0x168   : > { %v714_v21 = vadd.f32 1e-05, %v712_v20 }
 0x16a   : > { %2106 = vrsqrt.f32 %v714_v21 }
 0x173   : > { %v2105_v22 = vpop.eup %2104 }
 0x174   : > { %v717_v24 = vmul.f32 %v2105_v22, %v701_v8 }
 0x176   : > { %v725_v26 = vmul.f32 %v1906_v23, %v717_v24 }
 0x177   : > { %v2107_v27 = vpop.eup %2106 }
 0x178   : > { %v733_v28 = vadd.f32 %v1907_v25, %v725_v26  ;;  %v718_v29 = vmul.f32 %v2107_v27, %v702_v12 }
 0x17a   : > { %v737_v30 = vmul.f32 0.70710677, %v733_v28  ;;  %v726_v31 = vmul.f32 %v1906_v23, %v718_v29  ;;  %v735_v10 = vmul.f32 0.5, %v733_v28 }
 0x17c   : > { %v743_v32 = vand.u32 2147483647, %v737_v30  ;;  %v734_v33 = vadd.f32 %v1907_v25, %v726_v31  ;;  %vm739_vm1 = vcmp.ge.f32.partialorder %v737_v30, 0.0 }
 0x17d   : > { %v741_v7 = vsel %vm739_vm1, 1.0, %v2280_v6 }
 0x17e   : > { %v745_v34 = vmul.f32 0.3275911, %v743_v32  ;;  %v738_v35 = vmul.f32 0.70710677, %v734_v33  ;;  %v771_v40 = vsub.f32 0.0, %v743_v32  ;;  %v736_v16 = vmul.f32 0.5, %v734_v33 }
 0x180   : > { %v747_v36 = vadd.f32 1.0, %v745_v34  ;;  %v744_v37 = vand.u32 2147483647, %v738_v35  ;;  %v773_v41 = vmul.f32 %v771_v40, %v743_v32  ;;  %vm740_vm2 = vcmp.ge.f32.partialorder %v738_v35, 0.0  ;;  %v1912_v35 = vld [vmem:[%s2912_s6] ss:$0 sm:$0xff] }
 0x181   : > { %v742_v13 = vsel %vm740_vm2, 1.0, %v2280_v6 }
 0x182   : > { %2108 = vrcp.f32 %v747_v36  ;;  %v746_v38 = vmul.f32 0.3275911, %v744_v37  ;;  %v772_v42 = vsub.f32 0.0, %v744_v37  ;;  %v775_v45 = vmul.f32 1.442695, %v773_v41 }
 0x183   : > { %v1911_v36 = vld [vmem:[%s2911_s5] ss:$0 sm:$0xff] }
 0x184   : > { %v748_v39 = vadd.f32 1.0, %v746_v38  ;;  %v774_v46 = vmul.f32 %v772_v42, %v744_v37 }
 0x186   : > { %2110 = vrcp.f32 %v748_v39  ;;  %v777_v51 = vmul.f32 1.442695, %v774_v46 }
 0x187   : > { %2112 = vpow2.f32 %v775_v45 }
 0x188   : > { %2114 = vpow2.f32 %v777_v51 }
 0x18f   : > { %v2109_v43 = vpop.eup %2108 }
 0x190   : > { %v753_v44 = vmul.f32 1.0614054, %v2109_v43 }
 0x192   : > { %v755_v47 = vadd.f32 -1.4531521, %v753_v44 }
 0x193   : > { %v2111_v48 = vpop.eup %2110 }
 0x194   : > { %v757_v49 = vmul.f32 %v2109_v43, %v755_v47  ;;  %v754_v50 = vmul.f32 1.0614054, %v2111_v48  ;;  %v2113_v0 = vpop.eup %2112 }
 0x195   : > { %v2115_v5 = vpop.eup %2114 }
 0x196   : > { %v759_v52 = vadd.f32 1.4214138, %v757_v49  ;;  %v756_v53 = vadd.f32 -1.4531521, %v754_v50 }
 0x198   : > { %v761_v54 = vmul.f32 %v2109_v43, %v759_v52  ;;  %v758_v55 = vmul.f32 %v2111_v48, %v756_v53 }
 0x19a   : > { %v763_v56 = vadd.f32 -0.28449672, %v761_v54  ;;  %v760_v57 = vadd.f32 1.4214138, %v758_v55 }
 0x19c   : > { %v765_v58 = vmul.f32 %v2109_v43, %v763_v56  ;;  %v762_v59 = vmul.f32 %v2111_v48, %v760_v57 }
 0x19e   : > { %v767_v60 = vadd.f32 0.2548296, %v765_v58  ;;  %v764_v61 = vadd.f32 -0.28449672, %v762_v59 }
 0x1a0   : > { %v769_v62 = vmul.f32 %v2109_v43, %v767_v60  ;;  %v766_v63 = vmul.f32 %v2111_v48, %v764_v61 }
 0x1a2   : > { %v779_v1 = vmul.f32 %v2113_v0, %v769_v62  ;;  %v768_v2 = vadd.f32 0.2548296, %v766_v63 }
 0x1a4   : > { %v781_v3 = vsub.f32 1.0, %v779_v1  ;;  %v770_v4 = vmul.f32 %v2111_v48, %v768_v2 }
 0x1a6   : > { %v783_v8 = vmul.f32 %v781_v3, %v741_v7  ;;  %v780_v9 = vmul.f32 %v2115_v5, %v770_v4 }
 0x1a8   : > { %v785_v11 = vadd.f32 1.0, %v783_v8  ;;  %v782_v12 = vsub.f32 1.0, %v780_v9 }
 0x1aa   : > { %v787_v14 = vmul.f32 %v785_v11, %v735_v10  ;;  %v784_v15 = vmul.f32 %v782_v12, %v742_v13 }
 0x1ac   : > { %795 = vrot.lane.b32.xlu0 %v787_v14, %s2281_s3  ;;  %v786_v17 = vadd.f32 1.0, %v784_v15  ;;  %791 = vst.msk [vmem:[%s789_s29] sm:$0xff] %vm790_vm3, %v787_v14 }
 0x1ae   : > { %v788_v18 = vmul.f32 %v786_v17, %v736_v16 }
 0x1b0   : > { %797 = vrot.lane.b32.xlu1 %v788_v18, %s2281_s3  ;;  %792 = vst.msk [vmem:[%s789_s29 + $0x8] sm:$0xff] %vm790_vm3, %v788_v18 }
 0x21e   : > { %v796_v19 = vpop.permute.xlu0 %795 }
 0x21f   : > { %1909 = vst.msk [vmem:[%s789_s29 + $0x20] sm:$0xff] %vm790_vm3, %v796_v19  ;;  %v807_v20 = vsel %vm790_vm3, %v796_v19, 0.0 }
 0x220   : > { %808 = vadd.xlane.f32.xlu1 %v807_v20 }
 0x222   : > { %v798_v21 = vpop.permute.xlu1 %797 }
 0x223   : > { %1910 = vst.msk [vmem:[%s789_s29 + $0x28] sm:$0xff] %vm790_vm3, %v798_v21  ;;  %v810_v22 = vsel %vm790_vm3, %v798_v21, 0.0 }
 0x224   : > { %811 = vadd.xlane.f32.xlu0 %v810_v22 }
 0x2a9   : > { %v809_v23 = vpop.xlane.xlu1 %808 }
 0x2aa   : > { %v814_v24 = vmul.f32 0.0625, %v809_v23 }
 0x2ac   : > { %v816_v25 = vsub.f32 %v787_v14, %v814_v24 }
 0x2ad   : > { %v812_v26 = vpop.xlane.xlu0 %811 }
 0x2ae   : > { %v815_v27 = vmul.f32 0.0625, %v812_v26  ;;  %v818_v28 = vmul.f32 %v816_v25, %v816_v25 }
 0x2b0   : > { %v817_v29 = vsub.f32 %v788_v18, %v815_v27  ;;  %822 = vrot.lane.b32.xlu0 %v818_v28, %s2281_s3 }
 0x2b2   : > { %v819_v30 = vmul.f32 %v817_v29, %v817_v29 }
 0x2b4   : > { %824 = vrot.lane.b32.xlu1 %v819_v30, %s2281_s3 }
 0x322   : > { %v823_v31 = vpop.permute.xlu0 %822 }
 0x323   : > { %v828_v32 = vsel %vm790_vm3, %v823_v31, 0.0 }
 0x324   : > { %829 = vadd.xlane.f32.xlu1 %v828_v32 }
 0x326   : > { %v825_v33 = vpop.permute.xlu1 %824 }
 0x327   : > { %v831_v34 = vsel %vm790_vm3, %v825_v33, 0.0 }
 0x328   : > { %832 = vadd.xlane.f32.xlu0 %v831_v34 }
 0x335   : > { %857 = vrot.lane.b32.xlu1 %v1912_v35, %s2282_s27 }
 0x33e   : > { %847 = vrot.lane.b32.xlu0 %v1911_v36, %s2282_s27 }
 0x3ad   : > { %v830_v37 = vpop.xlane.xlu1 %829 }
 0x3ae   : > { %v834_v38 = vmul.f32 0.0625, %v830_v37 }
 0x3b0   : > { %v836_v39 = vadd.f32 1e-05, %v834_v38 }
 0x3b1   : > { %v833_v40 = vpop.xlane.xlu0 %832  ;;  %v858_v46 = vpop.permute.xlu1 %857 }
 0x3b2   : > { %2116 = vrsqrt.f32 %v836_v39  ;;  %v835_v41 = vmul.f32 0.0625, %v833_v40 }
 0x3b4   : > { %v837_v42 = vadd.f32 1e-05, %v835_v41 }
 0x3b5   : > { %v848_v44 = vpop.permute.xlu0 %847 }
 0x3b6   : > { %2118 = vrsqrt.f32 %v837_v42 }
 0x3bf   : > { %v2117_v43 = vpop.eup %2116 }
 0x3c0   : > { %v840_v45 = vmul.f32 %v2117_v43, %v816_v25 }
 0x3c2   : > { %v850_v47 = vmul.f32 %v848_v44, %v840_v45 }
 0x3c3   : > { %v2119_v48 = vpop.eup %2118 }
 0x3c4   : > { %v841_v49 = vmul.f32 %v2119_v48, %v817_v29  ;;  %v860_v50 = vadd.f32 %v858_v46, %v850_v47 }
 0x3c6   : > { %v851_v51 = vmul.f32 %v848_v44, %v841_v49  ;;  %v862_v52 = vmax.f32 %v860_v50, 0.0 }
 0x3c8   : > { %v861_v53 = vadd.f32 %v858_v46, %v851_v51  ;;  %v1964_v54 = vpack.c.bf16 %v862_v52, %v862_v52 }
 0x3ca   : > { %v863_v55 = vmax.f32 %v861_v53, 0.0  ;;  %870 = vrot.lane.b32.xlu1 %v1964_v54, %s2281_s3 }
 0x3cc   : > { %v1965_v56 = vpack.c.bf16 %v863_v55, %v863_v55 }
 0x3ce   : > { %872 = vrot.lane.b32.xlu1 %v1965_v56, %s2281_s3 }
 0x43c   : > { %v871_v57 = vpop.permute.xlu1 %870 }
 0x43d   : > { %881 = vst.msk [vmem:[%s879_s20] sm:$0xf] %vm880_vm4, %v871_v57  ;;  %885 = sbr.rel (%p1916_p12) target bundleno = 1973 (0x7b5), region = 138 }
 0x440   : > { %v873_v58 = vpop.permute.xlu1 %872 }
 0x441   : > { %882 = vst.msk [vmem:[%s879_s20 + $0x4] sm:$0xf] %vm880_vm4, %v873_v58 }
 0x442   : > { %v2530_v59 = vld [vmem:[%s2969_s26 + $0x10] sm:$0xff]  ;;  %v2535_v60 = vld [vmem:[%s2969_s26 + $0x18] sm:$0xff]  ;;  %v2540_v61 = vld [vmem:[%s2969_s26] sm:$0xff] }
 0x443   : > { %v900_v62 = vsel %vm790_vm3, %v2530_v59, 0.0  ;;  %v894_v63 = vsel %vm790_vm3, %v2540_v61, 0.0  ;;  %v2549_v0 = vld [vmem:[%s2969_s26 + $0x20] sm:$0xff]  ;;  %v903_v1 = vsel %vm790_vm3, %v2535_v60, 0.0  ;;  %v2558_v3 = vld [vmem:[%s2969_s26 + $0x8] sm:$0xff] }
 0x444   : > { %901 = vadd.xlane.f32.xlu0 %v900_v62  ;;  %895 = vadd.xlane.f32.xlu1 %v894_v63  ;;  %v906_v2 = vsel %vm790_vm3, %v2549_v0, 0.0  ;;  %v2563_v4 = vld [vmem:[%s2969_s26 + $0x28] sm:$0xff]  ;;  %v897_v5 = vsel %vm790_vm3, %v2558_v3, 0.0  ;;  %v1158_v38 = vld [vmem:[%s2920_s14] sm:$0xff] }
 0x445   : > { %v909_v6 = vsel %vm790_vm3, %v2563_v4, 0.0  ;;  %v1159_v37 = vld [vmem:[%s2920_s14 + $0x8] sm:$0xff]  ;;  %v1917_v58 = vld [vmem:[%s2970_s12] ss:$0 sm:$0xff] }
 0x446   : > { %2018 = vmatprep.subr.mxu1 %v1159_v37  ;;  %1985 = vmatprep.subr.mxu0 %v1159_v37  ;;  %v1918_v63 = vld [vmem:[%s2971_s13] ss:$0 sm:$0xff] }
 0x447   : > { %2020 = vmatpush3.msra.mxu1 %v1159_v37  ;;  %1986 = vmatpush3.msra.mxu0 %v1159_v37 }
 0x448   : > { %904 = vadd.xlane.f32.xlu0 %v903_v1  ;;  %907 = vadd.xlane.f32.xlu1 %v906_v2 }
 0x449   : > { %2019 = vmatprep.subr.mxu1 %v1158_v38  ;;  %1987 = vmatprep.subr.mxu0 %v1158_v38 }
 0x44a   : > { %2021 = vmatpush3.msra.mxu1 %v1158_v38  ;;  %1988 = vmatpush3.msra.mxu0 %v1158_v38 }
 0x44c   : > { %898 = vadd.xlane.f32.xlu0 %v897_v5  ;;  %910 = vadd.xlane.f32.xlu1 %v909_v6 }
 0x4cd   : > { %v902_v7 = vpop.xlane.xlu0 %901  ;;  %v896_v8 = vpop.xlane.xlu1 %895 }
 0x4ce   : > { %v914_v9 = vmul.f32 0.0625, %v902_v7  ;;  %v912_v10 = vmul.f32 0.0625, %v896_v8 }
 0x4d0   : > { %v2570_v11 = vsub.f32 %v2530_v59, %v914_v9  ;;  %v2573_v12 = vsub.f32 %v2540_v61, %v912_v10 }
 0x4d1   : > { %v905_v13 = vpop.xlane.xlu0 %904  ;;  %v908_v14 = vpop.xlane.xlu1 %907 }
 0x4d2   : > { %v915_v15 = vmul.f32 0.0625, %v905_v13  ;;  %v926_v16 = vmul.f32 %v2570_v11, %v2570_v11  ;;  %v916_v17 = vmul.f32 0.0625, %v908_v14  ;;  %v924_v18 = vmul.f32 %v2573_v12, %v2573_v12 }
 0x4d4   : > { %v2580_v19 = vsub.f32 %v2535_v60, %v915_v15  ;;  %v936_v20 = vsel %vm790_vm3, %v926_v16, 0.0  ;;  %v2584_v21 = vsub.f32 %v2549_v0, %v916_v17  ;;  %v930_v23 = vsel %vm790_vm3, %v924_v18, 0.0 }
 0x4d5   : > { %937 = vadd.xlane.f32.xlu0 %v936_v20  ;;  %v899_v22 = vpop.xlane.xlu0 %898  ;;  %v911_v24 = vpop.xlane.xlu1 %910 }
 0x4d6   : > { %v913_v25 = vmul.f32 0.0625, %v899_v22  ;;  %v927_v26 = vmul.f32 %v2580_v19, %v2580_v19  ;;  %v917_v27 = vmul.f32 0.0625, %v911_v24  ;;  %v928_v28 = vmul.f32 %v2584_v21, %v2584_v21 }
 0x4d8   : > { %v2592_v29 = vsub.f32 %v2558_v3, %v913_v25  ;;  %v939_v30 = vsel %vm790_vm3, %v927_v26, 0.0  ;;  %v2596_v31 = vsub.f32 %v2563_v4, %v917_v27  ;;  %v942_v33 = vsel %vm790_vm3, %v928_v28, 0.0 }
 0x4d9   : > { %940 = vadd.xlane.f32.xlu1 %v939_v30  ;;  %931 = vadd.xlane.f32.xlu0 %v930_v23 }
 0x4da   : > { %v925_v32 = vmul.f32 %v2592_v29, %v2592_v29  ;;  %v929_v34 = vmul.f32 %v2596_v31, %v2596_v31 }
 0x4dc   : > { %v933_v35 = vsel %vm790_vm3, %v925_v32, 0.0  ;;  %v945_v36 = vsel %vm790_vm3, %v929_v34, 0.0 }
 0x4dd   : > { %934 = vadd.xlane.f32.xlu0 %v933_v35  ;;  %943 = vadd.xlane.f32.xlu1 %v942_v33 }
 0x4e1   : > { %946 = vadd.xlane.f32.xlu1 %v945_v36 }
 0x55e   : > { %v938_v39 = vpop.xlane.xlu0 %937 }
 0x55f   : > { %v950_v40 = vmul.f32 0.0625, %v938_v39 }
 0x561   : > { %v956_v41 = vadd.f32 1e-05, %v950_v40 }
 0x562   : > { %v932_v42 = vpop.xlane.xlu0 %931  ;;  %v941_v43 = vpop.xlane.xlu1 %940 }
 0x563   : > { %2120 = vrsqrt.f32 %v956_v41  ;;  %v948_v44 = vmul.f32 0.0625, %v932_v42  ;;  %v951_v45 = vmul.f32 0.0625, %v941_v43 }
 0x565   : > { %v954_v46 = vadd.f32 1e-05, %v948_v44  ;;  %v957_v47 = vadd.f32 1e-05, %v951_v45 }
 0x566   : > { %v935_v48 = vpop.xlane.xlu0 %934  ;;  %v944_v49 = vpop.xlane.xlu1 %943 }
 0x567   : > { %2122 = vrsqrt.f32 %v954_v46  ;;  %v949_v50 = vmul.f32 0.0625, %v935_v48  ;;  %v952_v51 = vmul.f32 0.0625, %v944_v49 }
 0x568   : > { %2124 = vrsqrt.f32 %v957_v47 }
 0x569   : > { %v955_v52 = vadd.f32 1e-05, %v949_v50  ;;  %v958_v53 = vadd.f32 1e-05, %v952_v51 }
 0x56a   : > { %v947_v54 = vpop.xlane.xlu1 %946 }
 0x56b   : > { %2126 = vrsqrt.f32 %v955_v52  ;;  %v953_v55 = vmul.f32 0.0625, %v947_v54 }
 0x56c   : > { %2128 = vrsqrt.f32 %v958_v53 }
 0x56d   : > { %v959_v56 = vadd.f32 1e-05, %v953_v55 }
 0x56f   : > { %2130 = vrsqrt.f32 %v959_v56 }
 0x570   : > { %v2121_v57 = vpop.eup %2120 }
 0x571   : > { %v968_v62 = vmul.f32 %v2121_v57, %v2570_v11 }
 0x573   : > { %v980_v1 = vmul.f32 %v1917_v58, %v968_v62 }
 0x574   : > { %v2123_v2 = vpop.eup %2122 }
 0x575   : > { %v2125_v5 = vpop.eup %2124  ;;  %v2618_v6 = vadd.f32 %v1918_v63, %v980_v1  ;;  %v966_v7 = vmul.f32 %v2123_v2, %v2573_v12 }
 0x576   : > { %v969_v8 = vmul.f32 %v2125_v5, %v2580_v19 }
 0x577   : > { %v2623_v9 = vmul.f32 0.70710677, %v2618_v6  ;;  %v978_v10 = vmul.f32 %v1917_v58, %v966_v7 }
 0x578   : > { %v2127_v13 = vpop.eup %2126  ;;  %v981_v11 = vmul.f32 %v1917_v58, %v969_v8 }
 0x579   : > { %v2129_v14 = vpop.eup %2128  ;;  %v1022_v15 = vand.u32 2147483647, %v2623_v9  ;;  %v2626_v16 = vadd.f32 %v1918_v63, %v978_v10  ;;  %v967_v17 = vmul.f32 %v2127_v13, %v2592_v29  ;;  %vm1010_vm5 = vcmp.ge.f32.partialorder %v2623_v9, 0.0 }
 0x57a   : > { %v2629_v18 = vadd.f32 %v1918_v63, %v981_v11  ;;  %v970_v20 = vmul.f32 %v2129_v14, %v2584_v21 }
 0x57b   : > { %v1028_v12 = vmul.f32 0.3275911, %v1022_v15  ;;  %v2633_v19 = vmul.f32 0.70710677, %v2626_v16  ;;  %v979_v23 = vmul.f32 %v1917_v58, %v967_v17  ;;  %v1106_v38 = vsub.f32 0.0, %v1022_v15 }
 0x57c   : > { %v2636_v22 = vmul.f32 0.70710677, %v2629_v18  ;;  %v982_v28 = vmul.f32 %v1917_v58, %v970_v20  ;;  %v2131_v29 = vpop.eup %2130 }
 0x57d   : > { %v1034_v24 = vadd.f32 1.0, %v1028_v12  ;;  %v1020_v25 = vand.u32 2147483647, %v2633_v19  ;;  %v2640_v27 = vadd.f32 %v1918_v63, %v979_v23  ;;  %v971_v36 = vmul.f32 %v2131_v29, %v2596_v31 }
 0x57e   : > { %v1023_v26 = vand.u32 2147483647, %v2636_v22  ;;  %v2645_v35 = vadd.f32 %v1918_v63, %v982_v28  ;;  %v1112_v44 = vmul.f32 %v1106_v38, %v1022_v15  ;;  %vm1008_vm6 = vcmp.ge.f32.partialorder %v2633_v19, 0.0 }
 0x57f   : > { %2132 = vrcp.f32 %v1034_v24  ;;  %v1026_v30 = vmul.f32 0.3275911, %v1020_v25  ;;  %v2643_v33 = vmul.f32 0.70710677, %v2640_v27  ;;  %v983_v41 = vmul.f32 %v1917_v58, %v971_v36 }
 0x580   : > { %v1029_v21 = vmul.f32 0.3275911, %v1023_v26  ;;  %v2650_v40 = vmul.f32 0.70710677, %v2645_v35  ;;  %v1104_v46 = vsub.f32 0.0, %v1020_v25  ;;  %v1107_v47 = vsub.f32 0.0, %v1023_v26 }
 0x581   : > { %v1032_v32 = vadd.f32 1.0, %v1026_v30  ;;  %v1021_v37 = vand.u32 2147483647, %v2643_v33  ;;  %v2653_v45 = vadd.f32 %v1918_v63, %v983_v41  ;;  %v1120_v51 = vmul.f32 1.442695, %v1112_v44 }
 0x582   : > { %v1035_v34 = vadd.f32 1.0, %v1029_v21  ;;  %v1024_v43 = vand.u32 2147483647, %v2650_v40  ;;  %v1110_v54 = vmul.f32 %v1104_v46, %v1020_v25  ;;  %v1113_v55 = vmul.f32 %v1107_v47, %v1023_v26 }
 0x583   : > { %2134 = vrcp.f32 %v1032_v32  ;;  %v1027_v39 = vmul.f32 0.3275911, %v1021_v37  ;;  %v2656_v48 = vmul.f32 0.70710677, %v2653_v45  ;;  %v1105_v56 = vsub.f32 0.0, %v1021_v37 }
 0x584   : > { %2136 = vrcp.f32 %v1035_v34  ;;  %v1030_v31 = vmul.f32 0.3275911, %v1024_v43  ;;  %v1116_v7 = vmul.f32 1.442695, %v1110_v54  ;;  %v1122_v8 = vmul.f32 1.442695, %v1113_v55 }
 0x585   : > { %v1033_v42 = vadd.f32 1.0, %v1027_v39  ;;  %v1025_v52 = vand.u32 2147483647, %v2656_v48  ;;  %v1111_v13 = vmul.f32 %v1105_v56, %v1021_v37  ;;  %v1108_v11 = vsub.f32 0.0, %v1024_v43 }
 0x586   : > { %v1036_v49 = vadd.f32 1.0, %v1030_v31  ;;  %v2283_v56 = vmov -1.0   ;;  %vm1011_vm7 = vcmp.ge.f32.partialorder %v2636_v22, 0.0  ;;  %vm1009_vm8 = vcmp.ge.f32.partialorder %v2643_v33, 0.0 }
 0x587   : > { %2138 = vrcp.f32 %v1033_v42  ;;  %v1031_v57 = vmul.f32 0.3275911, %v1025_v52  ;;  %v1118_v25 = vmul.f32 1.442695, %v1111_v13  ;;  %v1114_v26 = vmul.f32 %v1108_v11, %v1024_v43 }
 0x588   : > { %2140 = vrcp.f32 %v1036_v49  ;;  %v1109_v32 = vsub.f32 0.0, %v1025_v52  ;;  %vm1012_vm9 = vcmp.ge.f32.partialorder %v2650_v40, 0.0  ;;  %vm1013_vm10 = vcmp.ge.f32.partialorder %v2656_v48, 0.0 }
 0x589   : > { %2142 = vpow2.f32 %v1120_v51  ;;  %v1037_v63 = vadd.f32 1.0, %v1031_v57  ;;  %v1124_v41 = vmul.f32 1.442695, %v1114_v26  ;;  %v1016_v57 = vsel %vm1010_vm5, 1.0, %v2283_v56 }
 0x58a   : > { %v1115_v31 = vmul.f32 %v1109_v32, %v1025_v52  ;;  %v1000_v40 = vmul.f32 0.5, %v2645_v35 }
 0x58b   : > { %2144 = vrcp.f32 %v1037_v63 }
 0x58c   : > { %v2133_v50 = vpop.eup %2132  ;;  %2146 = vpow2.f32 %v1116_v7 }
 0x58d   : > { %v1052_v53 = vmul.f32 1.0614054, %v2133_v50  ;;  %2148 = vpow2.f32 %v1122_v8 }
 0x58e   : > { %2150 = vpow2.f32 %v1118_v25 }
 0x58f   : > { %v1058_v58 = vadd.f32 -1.4531521, %v1052_v53  ;;  %2152 = vpow2.f32 %v1124_v41 }
 0x590   : > { %v2135_v62 = vpop.eup %2134 }
 0x591   : > { %v2659_v1 = vpop.eup %2136  ;;  %v1064_v2 = vmul.f32 %v2133_v50, %v1058_v58  ;;  %v1050_v5 = vmul.f32 1.0614054, %v2135_v62 }
 0x592   : > { %v1053_v10 = vmul.f32 1.0614054, %v2659_v1 }
 0x593   : > { %v1070_v14 = vadd.f32 1.4214138, %v1064_v2  ;;  %v1056_v15 = vadd.f32 -1.4531521, %v1050_v5 }
 0x594   : > { %v1059_v17 = vadd.f32 -1.4531521, %v1053_v10  ;;  %v2662_v23 = vpop.eup %2138  ;;  %v1126_v10 = vmul.f32 1.442695, %v1115_v31 }
 0x595   : > { %v1076_v20 = vmul.f32 %v2133_v50, %v1070_v14  ;;  %v1062_v12 = vmul.f32 %v2135_v62, %v1056_v15  ;;  %v1051_v30 = vmul.f32 1.0614054, %v2662_v23  ;;  %v2666_v38 = vpop.eup %2140 }
 0x596   : > { %v1065_v24 = vmul.f32 %v2659_v1, %v1059_v17  ;;  %v1054_v46 = vmul.f32 1.0614054, %v2666_v38  ;;  %v2143_v49 = vpop.eup %2142  ;;  %2154 = vpow2.f32 %v1126_v10 }
 0x597   : > { %v1082_v28 = vadd.f32 -0.28449672, %v1076_v20  ;;  %v1068_v29 = vadd.f32 1.4214138, %v1062_v12  ;;  %v1057_v37 = vadd.f32 -1.4531521, %v1051_v30 }
 0x598   : > { %v1071_v21 = vadd.f32 1.4214138, %v1065_v24  ;;  %v1060_v55 = vadd.f32 -1.4531521, %v1054_v46  ;;  %v2676_v63 = vpop.eup %2144 }
 0x599   : > { %v1088_v34 = vmul.f32 %v2133_v50, %v1082_v28  ;;  %v1074_v36 = vmul.f32 %v2135_v62, %v1068_v29  ;;  %v1063_v43 = vmul.f32 %v2662_v23, %v1057_v37  ;;  %v1055_v8 = vmul.f32 1.0614054, %v2676_v63  ;;  %v2147_v15 = vpop.eup %2146 }
 0x59a   : > { %v1077_v39 = vmul.f32 %v2659_v1, %v1071_v21  ;;  %v1066_v52 = vmul.f32 %v2666_v38, %v1060_v55  ;;  %v2149_v12 = vpop.eup %2148  ;;  %v998_v29 = vmul.f32 0.5, %v2618_v6  ;;  %v1017_v37 = vsel %vm1011_vm7, 1.0, %v2283_v56 }
 0x59b   : > { %v1094_v42 = vadd.f32 0.2548296, %v1088_v34  ;;  %v1080_v44 = vadd.f32 -0.28449672, %v1074_v36  ;;  %v1069_v54 = vadd.f32 1.4214138, %v1063_v43 }
 0x59c   : > { %v1083_v47 = vadd.f32 -0.28449672, %v1077_v39  ;;  %v1072_v9 = vadd.f32 1.4214138, %v1066_v52  ;;  %v1061_v20 = vadd.f32 -1.4531521, %v1055_v8 }
 0x59d   : > { %v1100_v51 = vmul.f32 %v2133_v50, %v1094_v42  ;;  %v1086_v53 = vmul.f32 %v2135_v62, %v1080_v44  ;;  %v1075_v7 = vmul.f32 %v2662_v23, %v1069_v54  ;;  %v2151_v42 = vpop.eup %2150 }
 0x59e   : > { %v1089_v58 = vmul.f32 %v2659_v1, %v1083_v47  ;;  %v1078_v28 = vmul.f32 %v2666_v38, %v1072_v9  ;;  %v1067_v30 = vmul.f32 %v2676_v63, %v1061_v20  ;;  %v996_v47 = vmul.f32 0.5, %v2626_v16 }
 0x59f   : > { %v1130_v2 = vmul.f32 %v2143_v49, %v1100_v51  ;;  %v1092_v5 = vadd.f32 0.2548296, %v1086_v53  ;;  %v1081_v14 = vadd.f32 -0.28449672, %v1075_v7  ;;  %v999_v53 = vmul.f32 0.5, %v2629_v18 }
 0x5a0   : > { %v1095_v50 = vadd.f32 0.2548296, %v1089_v58  ;;  %v1084_v36 = vadd.f32 -0.28449672, %v1078_v28  ;;  %v1073_v41 = vadd.f32 1.4214138, %v1067_v30 }
 0x5a1   : > { %v1136_v13 = vsub.f32 1.0, %v1130_v2  ;;  %v1098_v11 = vmul.f32 %v2135_v62, %v1092_v5  ;;  %v1087_v26 = vmul.f32 %v2662_v23, %v1081_v14  ;;  %v1015_v5 = vsel %vm1009_vm8, 1.0, %v2283_v56  ;;  %v1919_v28 = vld [vmem:[%s2921_s15] ss:$0 sm:$0xff] }
 0x5a2   : > { %v1101_v17 = vmul.f32 %v2659_v1, %v1095_v50  ;;  %v1014_v1 = vsel %vm1008_vm6, 1.0, %v2283_v56  ;;  %v1090_v46 = vmul.f32 %v2666_v38, %v1084_v36  ;;  %v1079_v49 = vmul.f32 %v2676_v63, %v1073_v41 }
 0x5a3   : > { %v1142_v24 = vmul.f32 %v1136_v13, %v1016_v57  ;;  %v1128_v25 = vmul.f32 %v2147_v15, %v1098_v11  ;;  %v1093_v34 = vadd.f32 0.2548296, %v1087_v26  ;;  %v2153_v57 = vpop.eup %2152  ;;  %v997_v50 = vmul.f32 0.5, %v2640_v27 }
 0x5a4   : > { %v1131_v62 = vmul.f32 %v2149_v12, %v1101_v17  ;;  %v1096_v51 = vadd.f32 0.2548296, %v1090_v46  ;;  %v1085_v55 = vadd.f32 -0.28449672, %v1079_v49  ;;  %v2155_v11 = vpop.eup %2154  ;;  %v1019_v27 = vsel %vm1013_vm10, 1.0, %v2283_v56 }
 0x5a5   : > { %v1148_v21 = vadd.f32 1.0, %v1142_v24  ;;  %v1134_v32 = vsub.f32 1.0, %v1128_v25  ;;  %v1099_v43 = vmul.f32 %v2662_v23, %v1093_v34 }
 0x5a6   : > { %v1137_v39 = vsub.f32 1.0, %v1131_v62  ;;  %v1102_v2 = vmul.f32 %v2666_v38, %v1096_v51  ;;  %v1091_v7 = vmul.f32 %v2676_v63, %v1085_v55  ;;  %v1018_v38 = vsel %vm1012_vm9, 1.0, %v2283_v56 }
 0x5a7   : > { %v1154_v6 = vmul.f32 %v1148_v21, %v998_v29  ;;  %v1140_v44 = vmul.f32 %v1134_v32, %v1014_v1  ;;  %v1129_v22 = vmul.f32 %v2151_v42, %v1099_v43 }
 0x5a8   : > { %v1143_v31 = vmul.f32 %v1137_v39, %v1017_v37  ;;  %v1132_v33 = vmul.f32 %v2153_v57, %v1102_v2  ;;  %v1097_v18 = vadd.f32 0.2548296, %v1091_v7 }
 0x5a9   : > { %1992 = vmatprep.mubr.msk.f32.mxu1 %vm790_vm3, %v1154_v6  ;;  %v1146_v19 = vadd.f32 1.0, %v1140_v44  ;;  %v1135_v58 = vsub.f32 1.0, %v1129_v22 }
 0x5aa   : > { %v1149_v54 = vadd.f32 1.0, %v1143_v31  ;;  %v1138_v10 = vsub.f32 1.0, %v1132_v33  ;;  %v1103_v13 = vmul.f32 %v2676_v63, %v1097_v18  ;;  %v1001_v63 = vmul.f32 0.5, %v2653_v45 }
 0x5ab   : > { %v1152_v23 = vmul.f32 %v1146_v19, %v996_v47  ;;  %v1141_v52 = vmul.f32 %v1135_v58, %v1015_v5 }
 0x5ac   : > { %v1155_v16 = vmul.f32 %v1149_v54, %v999_v53  ;;  %v1144_v9 = vmul.f32 %v1138_v10, %v1018_v38  ;;  %v1133_v15 = vmul.f32 %v2155_v11, %v1103_v13 }
 0x5ad   : > { %1989 = vmatprep.mubr.msk.f32.mxu0 %vm790_vm3, %v1152_v23  ;;  %v1147_v8 = vadd.f32 1.0, %v1141_v52 }
 0x5ae   : > { %1993 = vmatmul.mubr.msk.f32.vlgmr.msra.gmra.mxu1 %vm790_vm3, %v1155_v16  ;;  %v1150_v17 = vadd.f32 1.0, %v1144_v9  ;;  %v1139_v20 = vsub.f32 1.0, %v1133_v15 }
 0x5af   : > { %v1153_v14 = vmul.f32 %v1147_v8, %v997_v50 }
 0x5b0   : > { %v1156_v12 = vmul.f32 %v1150_v17, %v1000_v40  ;;  %v1145_v24 = vmul.f32 %v1139_v20, %v1019_v27 }
 0x5b1   : > { %1990 = vmatmul.mubr.msk.f32.vlgmr.msra.gmra.mxu0 %vm790_vm3, %v1153_v14 }
 0x5b2   : > { %1995 = vmatprep.mubr.msk.f32.mxu1 %vm790_vm3, %v1156_v12  ;;  %v1151_v25 = vadd.f32 1.0, %v1145_v24 }
 0x5b4   : > { %v1157_v26 = vmul.f32 %v1151_v25, %v1001_v63 }
 0x5b6   : > { %1996 = vmatmul.mubr.msk.f32.gmra.mxu1 %vm790_vm3, %v1157_v26 }
 0x66e   : > { %v1994_v48 = vpop.f32.mrf.mxu1 }
 0x66f   : > { %v1267_v62 = vadd.f32 %v1994_v48, %v1919_v28 }
 0x670   : > { %v1261_v35 = vpop.f32.mrf.mxu1 }
 0x671   : > { %v1991_v29 = vpop.f32.mrf.mxu0  ;;  %v1262_v56 = vadd.f32 %v1919_v28, %v1261_v35  ;;  %v1283_v1 = vadd.f32 %v1267_v62, %v2535_v60 }
 0x672   : > { %v1257_v30 = vadd.f32 %v1991_v29, %v1919_v28 }
 0x673   : > { %v1251_v21 = vpop.f32.mrf.mxu0  ;;  %v1282_v39 = vadd.f32 %v1262_v56, %v2530_v59  ;;  %v1297_v42 = vsel %vm790_vm3, %v1283_v1, 0.0 }
 0x674   : > { %v1252_v32 = vadd.f32 %v1919_v28, %v1251_v21  ;;  %v1281_v34 = vadd.f32 %v1257_v30, %v2558_v3 }
 0x675   : > { %v1294_v3 = vsel %vm790_vm3, %v1282_v39, 0.0 }
 0x676   : > { %v1291_v45 = vsel %vm790_vm3, %v1281_v34, 0.0  ;;  %v1280_v36 = vadd.f32 %v1252_v32, %v2540_v61  ;;  %v1997_v41 = vpop.f32.mrf.mxu1 }
 0x677   : > { %1292 = vadd.xlane.f32.xlu1 %v1291_v45  ;;  %v1277_v6 = vadd.f32 %v1997_v41, %v1919_v28  ;;  %v1926_v45 = vld [vmem:[%s2922_s16] ss:$0 sm:$0xff] }
 0x678   : > { %v1288_v37 = vsel %vm790_vm3, %v1280_v36, 0.0  ;;  %v1271_v44 = vpop.f32.mrf.mxu1 }
 0x679   : > { %1289 = vadd.xlane.f32.xlu0 %v1288_v37  ;;  %v1272_v43 = vadd.f32 %v1919_v28, %v1271_v44  ;;  %v1285_v61 = vadd.f32 %v1277_v6, %v2563_v4  ;;  %v1927_v37 = vld [vmem:[%s2923_s17] ss:$0 sm:$0xff] }
 0x67b   : > { %1298 = vadd.xlane.f32.xlu1 %v1297_v42  ;;  %v1303_v60 = vsel %vm790_vm3, %v1285_v61, 0.0  ;;  %v1284_v46 = vadd.f32 %v1272_v43, %v2549_v0 }
 0x67d   : > { %1295 = vadd.xlane.f32.xlu0 %v1294_v3  ;;  %v1300_v59 = vsel %vm790_vm3, %v1284_v46, 0.0 }
 0x67f   : > { %1304 = vadd.xlane.f32.xlu1 %v1303_v60 }
 0x681   : > { %1301 = vadd.xlane.f32.xlu0 %v1300_v59 }
 0x700   : > { %v1293_v47 = vpop.xlane.xlu1 %1292 }
 0x701   : > { %v1307_v31 = vmul.f32 0.0625, %v1293_v47 }
 0x702   : > { %v1290_v49 = vpop.xlane.xlu0 %1289 }
 0x703   : > { %v1313_v19 = vsub.f32 %v1281_v34, %v1307_v31  ;;  %v1306_v22 = vmul.f32 0.0625, %v1290_v49 }
 0x704   : > { %v1299_v51 = vpop.xlane.xlu1 %1298 }
 0x705   : > { %v1312_v53 = vsub.f32 %v1280_v36, %v1306_v22  ;;  %v1309_v54 = vmul.f32 0.0625, %v1299_v51  ;;  %v1319_v55 = vmul.f32 %v1313_v19, %v1313_v19 }
 0x706   : > { %v1296_v57 = vpop.xlane.xlu0 %1295 }
 0x707   : > { %v1315_v23 = vsub.f32 %v1283_v1, %v1309_v54  ;;  %v1308_v4 = vmul.f32 0.0625, %v1296_v57  ;;  %v1327_v58 = vsel %vm790_vm3, %v1319_v55, 0.0  ;;  %v1318_v2 = vmul.f32 %v1312_v53, %v1312_v53 }
 0x708   : > { %1328 = vadd.xlane.f32.xlu1 %v1327_v58  ;;  %v1305_v16 = vpop.xlane.xlu1 %1304 }
 0x709   : > { %v1314_v0 = vsub.f32 %v1282_v39, %v1308_v4  ;;  %v1324_v5 = vsel %vm790_vm3, %v1318_v2, 0.0  ;;  %v1321_v7 = vmul.f32 %v1315_v23, %v1315_v23  ;;  %v1311_v52 = vmul.f32 0.0625, %v1305_v16 }
 0x70a   : > { %1325 = vadd.xlane.f32.xlu0 %v1324_v5  ;;  %v1302_v33 = vpop.xlane.xlu0 %1301 }
 0x70b   : > { %v1333_v18 = vsel %vm790_vm3, %v1321_v7, 0.0  ;;  %v1320_v50 = vmul.f32 %v1314_v0, %v1314_v0  ;;  %v1317_v8 = vsub.f32 %v1285_v61, %v1311_v52  ;;  %v1310_v10 = vmul.f32 0.0625, %v1302_v33 }
 0x70c   : > { %1334 = vadd.xlane.f32.xlu1 %v1333_v18 }
 0x70d   : > { %v1330_v38 = vsel %vm790_vm3, %v1320_v50, 0.0  ;;  %v1316_v13 = vsub.f32 %v1284_v46, %v1310_v10  ;;  %v1323_v11 = vmul.f32 %v1317_v8, %v1317_v8 }
 0x70e   : > { %1331 = vadd.xlane.f32.xlu0 %v1330_v38 }
 0x70f   : > { %v1339_v14 = vsel %vm790_vm3, %v1323_v11, 0.0  ;;  %v1322_v9 = vmul.f32 %v1316_v13, %v1316_v13 }
 0x710   : > { %1340 = vadd.xlane.f32.xlu1 %v1339_v14 }
 0x711   : > { %v1336_v15 = vsel %vm790_vm3, %v1322_v9, 0.0 }
 0x712   : > { %1337 = vadd.xlane.f32.xlu0 %v1336_v15 }
 0x791   : > { %v1329_v40 = vpop.xlane.xlu1 %1328 }
 0x792   : > { %v1343_v17 = vmul.f32 0.0625, %v1329_v40 }
 0x793   : > { %v1326_v20 = vpop.xlane.xlu0 %1325 }
 0x794   : > { %v1349_v12 = vadd.f32 1e-05, %v1343_v17  ;;  %v1342_v27 = vmul.f32 0.0625, %v1326_v20 }
 0x795   : > { %v1335_v24 = vpop.xlane.xlu1 %1334 }
 0x796   : > { %2156 = vrsqrt.f32 %v1349_v12  ;;  %v1348_v63 = vadd.f32 1e-05, %v1342_v27  ;;  %v1345_v25 = vmul.f32 0.0625, %v1335_v24 }
 0x797   : > { %v1332_v26 = vpop.xlane.xlu0 %1331 }
 0x798   : > { %2158 = vrsqrt.f32 %v1348_v63  ;;  %v1351_v48 = vadd.f32 1e-05, %v1345_v25  ;;  %v1344_v28 = vmul.f32 0.0625, %v1332_v26 }
 0x799   : > { %v1341_v29 = vpop.xlane.xlu1 %1340 }
 0x79a   : > { %2160 = vrsqrt.f32 %v1351_v48  ;;  %v1350_v35 = vadd.f32 1e-05, %v1344_v28  ;;  %v1347_v62 = vmul.f32 0.0625, %v1341_v29 }
 0x79b   : > { %v1338_v30 = vpop.xlane.xlu0 %1337 }
 0x79c   : > { %2162 = vrsqrt.f32 %v1350_v35  ;;  %v1353_v21 = vadd.f32 1e-05, %v1347_v62  ;;  %v1346_v56 = vmul.f32 0.0625, %v1338_v30 }
 0x79e   : > { %2164 = vrsqrt.f32 %v1353_v21  ;;  %v1352_v32 = vadd.f32 1e-05, %v1346_v56 }
 0x7a0   : > { %2166 = vrsqrt.f32 %v1352_v32 }
 0x7a3   : > { %v2157_v34 = vpop.eup %2156 }
 0x7a4   : > { %v1361_v36 = vmul.f32 %v2157_v34, %v1313_v19 }
 0x7a5   : > { %v2159_v1 = vpop.eup %2158 }
 0x7a6   : > { %v1373_v39 = vmul.f32 %v1926_v45, %v1361_v36  ;;  %v1360_v41 = vmul.f32 %v2159_v1, %v1312_v53 }
 0x7a7   : > { %v2161_v42 = vpop.eup %2160 }
 0x7a8   : > { %v1385_v6 = vadd.f32 %v1927_v37, %v1373_v39  ;;  %v1372_v44 = vmul.f32 %v1926_v45, %v1360_v41  ;;  %v1363_v3 = vmul.f32 %v2161_v42, %v1315_v23 }
 0x7a9   : > { %v2163_v43 = vpop.eup %2162 }
 0x7aa   : > { %1391 = vst.msk [vmem:[%s2925_s19 + $0x8] sm:$0xff] %vm790_vm3, %v1385_v6  ;;  %v1384_v61 = vadd.f32 %v1927_v37, %v1372_v44  ;;  %v1375_v60 = vmul.f32 %v1926_v45, %v1363_v3  ;;  %v1362_v46 = vmul.f32 %v2163_v43, %v1314_v0 }
 0x7ab   : > { %v2165_v59 = vpop.eup %2164 }
 0x7ac   : > { %1390 = vst.msk [vmem:[%s2925_s19] sm:$0xff] %vm790_vm3, %v1384_v61  ;;  %v1387_v47 = vadd.f32 %v1927_v37, %v1375_v60  ;;  %v1374_v31 = vmul.f32 %v1926_v45, %v1362_v46  ;;  %v1365_v49 = vmul.f32 %v2165_v59, %v1317_v8 }
 0x7ad   : > { %v2167_v19 = vpop.eup %2166 }
 0x7ae   : > { %1393 = vst.msk [vmem:[%s2925_s19 + $0x18] sm:$0xff] %vm790_vm3, %v1387_v47  ;;  %v1386_v22 = vadd.f32 %v1927_v37, %v1374_v31  ;;  %v1377_v51 = vmul.f32 %v1926_v45, %v1365_v49  ;;  %v1364_v53 = vmul.f32 %v2167_v19, %v1316_v13 }
 0x7b0   : > { %1392 = vst.msk [vmem:[%s2925_s19 + $0x10] sm:$0xff] %vm790_vm3, %v1386_v22  ;;  %v1389_v54 = vadd.f32 %v1927_v37, %v1377_v51  ;;  %v1376_v55 = vmul.f32 %v1926_v45, %v1364_v53 }
 0x7b2   : > { %1395 = vst.msk [vmem:[%s2925_s19 + $0x28] sm:$0xff] %vm790_vm3, %v1389_v54  ;;  %v1388_v57 = vadd.f32 %v1927_v37, %v1376_v55 }
 0x7b4   : > { %1394 = vst.msk [vmem:[%s2925_s19 + $0x20] sm:$0xff] %vm790_vm3, %v1388_v57 }
 0x7b5 PF: > { %p1928_p13 = scmp.le.s32.totalorder %s2266_s1, 0 }
 0x7b6   : > { %s2770_s30 = sadd.s32 (!%p1928_p13), 4294967295, %s2266_s1  ;;  %s2773_s20 = sshra.s32 (!%p1928_p13), %s2467_s2, 3 }
 0x7b7   : > { %1399 = sbr.rel (%p1928_p13) target bundleno = 3150 (0xc4e), region = 142  ;;  %s2972_s8 = sld [smem:[#allocation28_spill]] (!%p1928_p13) }
 0x7b8   : > { %p1401_p0 = scmp.lt.s32.totalorder (!%p1928_p13), %s2770_s30, 0  ;;  %s1402_s22 = ssub.s32 (!%p1928_p13), 0, %s2770_s30 }
 0x7b9   : > { %s1930_s27 = smin.u32 (!%p1928_p13), %s2770_s30, %s1402_s22  ;;  %s1933_s3 = sshll.u32 (!%p1928_p13), %s2773_s20, 2 }
 0x7ba   : > { %s1404_s24 = sand.u32 (!%p1928_p13), 1, %s1930_s27   ;;  %s1417_s18 = scalar_lea.vmem (!%p1928_p13), [#allocation5], %s1933_s3 }
 0x7bb   : > { %s1405_s11 = ssub.s32 (!%p1928_p13), 0, %s1404_s24  ;;  %p1948_p3 = scmp.ge.s32.totalorder (!%p1928_p13), %s2266_s1, 2 }
 0x7bc   : > { %v2284_v4 = vmov 0.0   ;;  %vm2285_vm11 = vmmov 0   ;;  %s2997_s11 = smov (!%p1401_p0, %s1405_s11), %s1404_s24  ;;  %vm1510_vm12 = vcmask 130048   ;;  %v2173_v0 = vld [vmem:[%s2913_s7] sm:$0xff]   ;;  %vm1444_vm13 = vcmask 261120  }
 0x7bd   : > { %v2171_v23 = vld [vmem:[%s2972_s8] sm:$0xff]   ;;  %1998 = vmatprep.subr.bf16.mxu0 %v2284_v4  ;;  %2002 = vmatprep.mubr.msk.bf16.mxu0 %vm2285_vm11, %v2284_v4  ;;  %p1932_p2 = scmp.lt.s32.totalorder %s2997_s11, 0  ;;  %s1411_s25 = sadd.s32 2, %s2997_s11 }
 0x7be   : > { %2006 = vmatprep.subr.bf16.mxu1 %v2284_v4  ;;  %2008 = vmatprep.mubr.msk.bf16.mxu1 %vm2285_vm11, %v2284_v4  ;;  %v2170_v5 = vld [vmem:[%s1417_s18] sm:$0xff]  }
 0x7bf   : > { %2007 = vmatpush3.bf16.msra.mxu1 %v2171_v23  ;;  %s2999_s25 = smov (!%p1932_p2, %s1411_s25), %s2997_s11  ;;  %v1946_v14 = vld [vmem:[%s2915_s9] ss:$0 sm:$0xff] }
 0x7c0   : > { %2012 = vmatprep.subr.bf16.mxu1 %v2284_v4  ;;  %s1413_s29 = ssub.s32 1, %s2999_s25  ;;  %s1966_s22 = sshll.u32 %s2999_s25, 4 }
 0x7c1   : > { %s1934_s4 = sshll.u32 %s2999_s25, 2  ;;  %s1422_s8 = scalar_lea.vmem [#allocation4], %s1966_s22 }
 0x7c2   : > { %v2168_v58 = vld [vmem:[%s1422_s8 + $0x8] sm:$0xff]   ;;  %s1489_s12 = sadd.s32 %s1934_s4, %s2773_s20  ;;  %v2169_v2 = vld [vmem:[%s1422_s8] sm:$0xff]   ;;  %s1947_s4 = sshll.u32 %s2770_s30, 5 }
 0x7c3   : > { %s1940_s13 = sshll.u32 %s1489_s12, 2  ;;  %1999 = vmatpush3.bf16.msra.mxu0 %v2168_v58  ;;  %s2799_s8 = sadd.s32 %s1947_s4, %s2467_s2 }
 0x7c4   : > { %2000 = vmatprep.subr.bf16.mxu0 %v2284_v4  ;;  %s1491_s24 = scalar_lea.vmem [#allocation4], %s1940_s13  ;;  %s1616_s11 = scalar_lea.vmem [#allocation2], %s2799_s8 }
 0x7c5   : > { %v2172_v16 = vld [vmem:[%s1491_s24] sm:$0xff]   ;;  %v1618_v24 = vld [vmem:[%s1616_s11 + $0x8] sm:$0xff]  ;;  %s1625_s30 = scalar_lea.vmem (!%p1948_p3), [#allocation3], %s2799_s8  ;;  %s1953_s18 = sshll.u32 (!%p1948_p3), %s1413_s29, 2 }
 0x7c6   : > { %2009 = vmatmul.mubr.msk.bf16.vlgmr.msra.gmra.mxu1 %vm1510_vm12, %v2172_v16  ;;  %v1617_v15 = vld [vmem:[%s1616_s11] sm:$0xff]  ;;  %s1684_s3 = sadd.s32 (!%p1948_p3), %s1953_s18, %s2773_s20 }
 0x7c7   : > { %2001 = vmatpush3.bf16.msra.mxu0 %v2169_v2  ;;  %2013 = vmatpush3.bf16.msra.mxu1 %v2173_v0  ;;  %s1954_s8 = sshll.u32 (!%p1948_p3), %s1684_s3, 2 }
 0x7c8   : > { %2014 = vmatprep.mubr.msk.bf16.mxu1 %vm2285_vm11, %v2284_v4  ;;  %s1686_s25 = scalar_lea.vmem (!%p1948_p3), [#allocation4], %s1954_s8 }
 0x7ca   : > { %2003 = vmatmul.mubr.msk.bf16.vlgmr.msra.gmra.mxu0 %vm1444_vm13, %v2170_v5 }
 0x886   : > { %v1548_v7 = vpop.f32.mrf.mxu1 }
 0x888   : > { %v2010_v52 = vpop.f32.mrf.mxu1 }
 0x88a   : > { %v1482_v33 = vpop.f32.mrf.mxu0  ;;  %v1551_v18 = vpop.f32.mrf.mxu1 }
 0x88c   : > { %v2004_v50 = vpop.f32.mrf.mxu0  ;;  %v2011_v8 = vpop.f32.mrf.mxu1 }
 0x88e   : > { %v1485_v10 = vpop.f32.mrf.mxu0 }
 0x88f   : > { %v1494_v38 = vpack.c.bf16 %v1485_v10, %v1482_v33 }
 0x890   : > { %v2005_v13 = vpop.f32.mrf.mxu0 }
 0x891   : > { %2015 = vmatmul.mubr.msk.bf16.vlgmr.msra.gmra.mxu1 %vm1510_vm12, %v1494_v38 }
 0x951   : > { %v1598_v11 = vpop.f32.mrf.mxu1 }
 0x952   : > { %v1599_v9 = vadd.f32 %v1598_v11, %v1548_v7 }
 0x953   : > { %v2016_v40 = vpop.f32.mrf.mxu1 }
 0x954   : > { %v1612_v17 = vadd.f32 %v1946_v14, %v1599_v9 }
 0x955   : > { %v1601_v20 = vpop.f32.mrf.mxu1 }
 0x956   : > { %v1619_v12 = vadd.f32 %v1617_v15, %v1612_v17  ;;  %v1602_v27 = vadd.f32 %v1601_v20, %v1551_v18  ;;  %1624 = sbr.rel (%p1948_p3) target bundleno = 2712 (0xa98), region = 146 }
 0x957   : > { %v2017_v63 = vpop.f32.mrf.mxu1 }
 0x958   : > { %v1613_v25 = vadd.f32 %v1946_v14, %v1602_v27 }
 0x95a   : > { %v1620_v26 = vadd.f32 %v1618_v24, %v1613_v25 }
 0x95b   : > { %v1630_v48 = vsel %vm1510_vm12, %v1619_v12, 0.0  ;;  %1626 = vst.msk [vmem:[%s1625_s30] sm:$0xff] %vm1510_vm12, %v1619_v12  ;;  %v1949_v3 = vld [vmem:[%s2911_s5] ss:$0 sm:$0xff]  ;;  %vm1687_vm14 = vcmask 125952  }
 0x95c   : > { %1631 = vadd.xlane.f32.xlu0 %v1630_v48  ;;  %v1633_v28 = vsel %vm1510_vm12, %v1620_v26, 0.0  ;;  %1627 = vst.msk [vmem:[%s1625_s30 + $0x8] sm:$0xff] %vm1510_vm12, %v1620_v26  ;;  %v1950_v61 = vld [vmem:[%s2912_s6] ss:$0 sm:$0xff] }
 0x960   : > { %1634 = vadd.xlane.f32.xlu0 %v1633_v28 }
 0x9e5   : > { %v1632_v35 = vpop.xlane.xlu0 %1631 }
 0x9e6   : > { %v1637_v29 = vmul.f32 0.0625, %v1632_v35 }
 0x9e8   : > { %v1639_v62 = vsub.f32 %v1619_v12, %v1637_v29 }
 0x9e9   : > { %v1635_v30 = vpop.xlane.xlu0 %1634 }
 0x9ea   : > { %v1638_v21 = vmul.f32 0.0625, %v1635_v30  ;;  %v1641_v56 = vmul.f32 %v1639_v62, %v1639_v62 }
 0x9ec   : > { %v1640_v32 = vsub.f32 %v1620_v26, %v1638_v21  ;;  %v1643_v34 = vsel %vm1510_vm12, %v1641_v56, 0.0 }
 0x9ed   : > { %1644 = vadd.xlane.f32.xlu1 %v1643_v34 }
 0x9ee   : > { %v1642_v45 = vmul.f32 %v1640_v32, %v1640_v32 }
 0x9f0   : > { %v1646_v36 = vsel %vm1510_vm12, %v1642_v45, 0.0 }
 0x9f1   : > { %1647 = vadd.xlane.f32.xlu1 %v1646_v36 }
 0xa76   : > { %v1645_v1 = vpop.xlane.xlu1 %1644 }
 0xa77   : > { %v1649_v37 = vmul.f32 0.0625, %v1645_v1 }
 0xa79   : > { %v1651_v39 = vadd.f32 1e-05, %v1649_v37 }
 0xa7a   : > { %v1648_v41 = vpop.xlane.xlu1 %1647 }
 0xa7b   : > { %2174 = vrsqrt.f32 %v1651_v39  ;;  %v1650_v42 = vmul.f32 0.0625, %v1648_v41 }
 0xa7d   : > { %v1652_v6 = vadd.f32 1e-05, %v1650_v42 }
 0xa7f   : > { %2176 = vrsqrt.f32 %v1652_v6 }
 0xa88   : > { %v2175_v44 = vpop.eup %2174 }
 0xa89   : > { %v1655_v43 = vmul.f32 %v2175_v44, %v1639_v62 }
 0xa8b   : > { %v1663_v60 = vmul.f32 %v1949_v3, %v1655_v43 }
 0xa8c   : > { %v2177_v46 = vpop.eup %2176 }
 0xa8d   : > { %v1671_v59 = vadd.f32 %v1950_v61, %v1663_v60  ;;  %v1656_v47 = vmul.f32 %v2177_v46, %v1640_v32 }
 0xa8f   : > { %v1673_v31 = vmax.f32 %v1671_v59, 0.0  ;;  %v1664_v49 = vmul.f32 %v1949_v3, %v1656_v47 }
 0xa91   : > { %v1967_v19 = vpack.c.bf16 %v1673_v31, %v1673_v31  ;;  %v1672_v22 = vadd.f32 %v1950_v61, %v1664_v49 }
 0xa93   : > { %1688 = vst.msk [vmem:[%s1686_s25] sm:$0xf] %vm1687_vm14, %v1967_v19  ;;  %v1674_v51 = vmax.f32 %v1672_v22, 0.0 }
 0xa95   : > { %v1968_v53 = vpack.c.bf16 %v1674_v51, %v1674_v51 }
 0xa97   : > { %1689 = vst.msk [vmem:[%s1686_s25 + $0x4] sm:$0xf] %vm1687_vm14, %v1968_v53 }
 0xa98 PF: > { %p1955_p4 = scmp.ne.s32.totalorder %s2266_s1, 2 }
 0xa99   : > { %s2286_s20 = smov (!%p1955_p4), 16   ;;  %s1694_s29 = scalar_lea.vmem (!%p1955_p4), [#allocation3], %s2467_s2 }
 0xa9a   : > { %1693 = sbr.rel (%p1955_p4) target bundleno = 3150 (0xc4e), region = 150  ;;  %s2973_s11 = sld [smem:[#allocation29_spill]] (!%p1955_p4) }
 0xa9f   : > { %1699 = vrot.lane.b32.xlu0 %v1619_v12, %s2286_s20  ;;  %v1695_v54 = vld [vmem:[%s1694_s29] sm:$0xff]  ;;  %v1696_v58 = vld [vmem:[%s1694_s29 + $0x8] sm:$0xff] }
 0xaa0   : > { %v1707_v55 = vld [vmem:[%s2478_s0] sm:$0xff]  ;;  %v1708_v2 = vld [vmem:[%s2478_s0 + $0x8] sm:$0xff] }
 0xaa1   : > { %v1956_v63 = vld [vmem:[%s2916_s10] ss:$0 sm:$0xff] }
 0xaa3   : > { %1701 = vrot.lane.b32.xlu0 %v1620_v26, %s2286_s20  ;;  %v1957_v26 = vld [vmem:[%s2973_s11] ss:$0 sm:$0xff] }
 0xb11   : > { %v1700_v57 = vpop.permute.xlu0 %1699 }
 0xb12   : > { %v1705_v23 = vsel %vm1510_vm12, %v1695_v54, %v1700_v57 }
 0xb13   : > { %v1709_v4 = vadd.f32 %v1707_v55, %v1705_v23 }
 0xb15   : > { %v1702_v0 = vpop.permute.xlu0 %1701  ;;  %v1713_v16 = vsel %vm1444_vm13, %v1709_v4, 0.0 }
 0xb16   : > { %v1706_v5 = vsel %vm1510_vm12, %v1696_v58, %v1702_v0  ;;  %1714 = vadd.xlane.f32.xlu1 %v1713_v16 }
 0xb17   : > { %v1710_v7 = vadd.f32 %v1708_v2, %v1706_v5 }
 0xb19   : > { %v1716_v52 = vsel %vm1444_vm13, %v1710_v7, 0.0 }
 0xb1a   : > { %1717 = vadd.xlane.f32.xlu1 %v1716_v52 }
 0xb9f   : > { %v1715_v33 = vpop.xlane.xlu1 %1714 }
 0xba0   : > { %v1720_v18 = vmul.f32 0.03125, %v1715_v33 }
 0xba2   : > { %v1722_v50 = vsub.f32 %v1709_v4, %v1720_v18 }
 0xba3   : > { %v1718_v8 = vpop.xlane.xlu1 %1717 }
 0xba4   : > { %v1721_v10 = vmul.f32 0.03125, %v1718_v8  ;;  %v1724_v38 = vmul.f32 %v1722_v50, %v1722_v50 }
 0xba6   : > { %v1723_v13 = vsub.f32 %v1710_v7, %v1721_v10  ;;  %v1726_v11 = vsel %vm1444_vm13, %v1724_v38, 0.0 }
 0xba7   : > { %1727 = vadd.xlane.f32.xlu0 %v1726_v11 }
 0xba8   : > { %v1725_v14 = vmul.f32 %v1723_v13, %v1723_v13 }
 0xbaa   : > { %v1729_v9 = vsel %vm1444_vm13, %v1725_v14, 0.0 }
 0xbab   : > { %1730 = vadd.xlane.f32.xlu1 %v1729_v9 }
 0xc30   : > { %v1728_v15 = vpop.xlane.xlu0 %1727 }
 0xc31   : > { %v1732_v40 = vmul.f32 0.03125, %v1728_v15 }
 0xc33   : > { %v1734_v17 = vadd.f32 1e-05, %v1732_v40 }
 0xc34   : > { %v1731_v20 = vpop.xlane.xlu1 %1730 }
 0xc35   : > { %2178 = vrsqrt.f32 %v1734_v17  ;;  %v1733_v12 = vmul.f32 0.03125, %v1731_v20 }
 0xc37   : > { %v1735_v27 = vadd.f32 1e-05, %v1733_v12 }
 0xc39   : > { %2180 = vrsqrt.f32 %v1735_v27 }
 0xc42   : > { %v2179_v24 = vpop.eup %2178 }
 0xc43   : > { %v1738_v25 = vmul.f32 %v2179_v24, %v1722_v50 }
 0xc45   : > { %v1746_v48 = vmul.f32 %v1956_v63, %v1738_v25 }
 0xc46   : > { %v2181_v28 = vpop.eup %2180 }
 0xc47   : > { %v1754_v35 = vadd.f32 %v1957_v26, %v1746_v48  ;;  %v1739_v29 = vmul.f32 %v2181_v28, %v1723_v13 }
 0xc49   : > { %1756 = vst.msk [vmem:[%s2480_s23] sm:$0xff] %vm1444_vm13, %v1754_v35  ;;  %v1747_v62 = vmul.f32 %v1956_v63, %v1739_v29 }
 0xc4b   : > { %v1755_v30 = vadd.f32 %v1957_v26, %v1747_v62 }
 0xc4d   : > { %1757 = vst.msk [vmem:[%s2480_s23 + $0x8] sm:$0xff] %vm1444_vm13, %v1755_v30 }
 0xc4e PF: > { %s2974_s30 = sld [smem:[#allocation13_spill]]  ;;  %s1774_s22 = sshll.u32 %s2480_s23, 4  ;;  %s2846_s22 = int_to_ptr.vmem [resolvable:$true] %s1774_s22 }
 0xc4f   : > { %s3001_s21 = smov (!%p606_p1, %s2262_s21), 0  ;;  %s2976_s4 = sld [smem:[#allocation32_spill]] }
 0xc50   : > { %s1969_s27 = sshll.u32 %s3001_s21, 8  ;;  %s2182_s29 = scalar_lea.vmem %s2846_s22, 256 }
 0xc51   : > { %p2183_p5 = scmp.ne.s32.totalorder %s2846_s22, %s2182_s29  ;;  %s2287_s1 = smov [#allocation7]  }
 0xc52   : > { %s2186_s23 = sshll.u32 %s2287_s1, 4  ;;  %s2187_s23 = int_to_ptr.vmem [resolvable:$false] %s2186_s23 }
 0xc53   : > { %p2184_p6 = pnand %p2183_p5, %p2445_p7  ;;  %s2188_s0 = scalar_lea.vmem %s2187_s23, 512 }
 0xc54   : > { %s2977_s25 = sand.u32 1, %s2974_s30   ;;  %p2189_p1 = scmp.lt.s32.totalorder %s2846_s22, %s2187_s23 }
 0xc55   : > { %s2851_s8 = scalar_lea.hbm %s2976_s4, %s1969_s27  ;;  %s2855_s20 = scalar_lea.sflag [#allocation8], %s2977_s25 }
 0xc56   : > { %p2185_p9 = pneg %p2184_p6  ;;  %p2190_p10 = scmp.lt.s32.totalorder %s2188_s0, %s2182_s29 }
 0xc58   : > { %p2191_p11 = por %p2190_p10, %p2189_p1 }
 0xc5a   : > { %p2192_p12 = pnand %p2191_p11, %p2185_p9 }
 0xc5c   : > { %2195 = shalt.err (!%p2192_p12)
}
 0xc5d   : > { %s2196_s21 = scalar_lea.hbm %s2851_s8, 256  ;;  %s2200_s13 = scalar_lea.hbm %s2976_s4, 512 }
 0xc5e   : > { %p2197_p13 = scmp.ne.s32.totalorder %s2851_s8, %s2196_s21  ;;  %p2201_p3 = scmp.lt.s32.totalorder %s2851_s8, %s2976_s4 }
 0xc5f   : > { %p2202_p4 = scmp.lt.s32.totalorder %s2200_s13, %s2196_s21 }
 0xc60   : > { %p2198_p0 = pnand %p2197_p13, %p2445_p7 }
 0xc61   : > { %p2203_p5 = por %p2202_p4, %p2201_p3 }
 0xc62   : > { %p2199_p2 = pneg %p2198_p0 }
 0xc64   : > { %p2204_p6 = pnand %p2203_p5, %p2199_p2 }
 0xc66   : > { %2207 = shalt.err (!%p2204_p6)
}
 0xc67   : > { %s2288_s27 = smov 128   ;;  %s2289_s3 = smov 8  }
 0xc68   : > { %2024 = dma.vmem_to_hbm [thread:$0]  (%p2445_p7), %s2846_s22, 256, %s2851_s8, %s2855_s20, %s2288_s27, %s2288_s27, %s2289_s3  }
 0xc69 PF: > { %s2978_s24 = sld [smem:[#allocation17_spill]] }
 0xc6a   : > { %s2979_s25 = sld [smem:[#allocation12_spill]] }
 0xc6f   : > { %p2030_p9 = scmp.ge.s32.totalorder %s2978_s24, 2 }
 0xc70   : > { %s1795_s1 = sand.u32 1, %s2979_s25  }
 0xc71   : > { %p2027_p1 = pnand %p2030_p9, %p2449_p8  ;;  %s1796_s23 = scalar_lea.sflag [#allocation8], %s1795_s1 }
 0xc73   : > { %p2028_p10 = pneg %p2027_p1 }
 0xc75   : > { %2245 = dma.done.wait (%p2028_p10), %s1796_s23, 256  }
 0xc76   : > { %2247 = vsyncadd (%p2028_p10), %s1796_s23, 4294967040  ;;  %s33_s23 = sadd.s32 1, %s2978_s24   ;;  %s2981_s0 = sld [smem:[#allocation13_spill]] }
 0xc77   : > { %p30_p11 = scmp.ge.s32.totalorder %s33_s23, 8   ;;  %s2982_s30 = sld [smem:[#allocation14_spill]] }
 0xc78   : > { %s2983_s20 = sld [smem:[#allocation22_spill]] }
 0xc79   : > { %s2984_s21 = sld [smem:[#allocation15_spill]]  ;;  %32 = sbr.rel (!%p30_p11) target bundleno = 16 (0x10), region = 211 }
 0xc7a   : > { %s2985_s1 = sld [smem:[#allocation16_spill]] }
 0xc7b   : > { %s2986_s22 = sld [smem:[#allocation18_spill]] }
 0xc7c   : > { %s2987_s2 = sld [smem:[#allocation19_spill]] }
 0xc7e   :  { %1801 = vsyncpa [#allocation8], 1 }
 0xc7f   :  { %1803 = vsyncpa [#allocation8 + $0x1], 1 }
 0xc80   :  { %1804 = vsyncmov [#allocation6] }
 0xc83   :  { %s1805_s18 = vpop.sfrf %1804 }
 0xc84   :  { %p1963_p7 = scmp.ne.s32.totalorder %s1805_s18, 0 }
 0xc86   :  { %1809 = shalt.err (%p1963_p7)  }

</bundles_post_ra>
